<compile_context>
chip_gen: v6e
topology: v6e:2x2x1
jax: 0.10.0
libtpu: 0.0.40
codegen_flags: <defaults>
</compile_context>

<pallas_src>
import math

import numpy as np
import jax
import jax.numpy as jnp
from jax.experimental import pallas as pl
from jax.experimental.pallas import tpu as pltpu

# ----------------------- config (small, BERT-like) --------------------------
B, T = 2, 8
M = B * T
HIDDEN = 32
N_HEADS = 4
HEAD_DIM = HIDDEN // N_HEADS
INTERMEDIATE = 64
N_LAYERS = 2
VOCAB = 100
LANE = 128                 # lane-dense padding target for all narrow dims
MAX_POS = 16
TYPE_VOCAB = 2
MASK_TOKEN_ID = 4
LN_EPS = 1e-12
MASK_NEG = -1e9            # additive bias (HF get_extended_attention_mask)

_VMEM = pl.BlockSpec(memory_space=pltpu.MemorySpace.VMEM)


def _gelu(x):
    # TODO(synk): HF BERT "gelu" is the exact erf form; tanh approximation is
    # used here for robust Mosaic lowering inside the kernel.
    return jax.nn.gelu(x, approximate=True)


# ------------------------------ fused kernel --------------------------------
def _bert_fused_kernel(
    # activations / mask
    emb_ref, mask_ref,
    # per-layer packed weights (leading axis = layer)
    w_qkvo_ref,    # (L, HIDDEN, 128)   [Wq | Wk | Wv | Wo] on lanes
    b_qkv_ref,     # (L, 1, 128)        [bq | bk | bv | 0 ]
    w_ffi_ref,     # (L, HIDDEN, 128)   Wi lane-padded 64 -> 128
    w_ffo_ref,     # (L, 128, 128)      Wo2 zero-padded to (128, 128)
    vec_layer_ref, # (L, 8, 128) rows: bo, aln_g, aln_b, bi, bo2, oln_g, oln_b
    # cls head
    w_head_ref,    # (64, 128)  rows 0:32 = cls_w (lanes 0:32), 32:64 = dec_w
    vec_global_ref,# (8, 128) rows: emb_ln_g, emb_ln_b, cls_b, cls_ln_g,
                   #               cls_ln_b, dec_b
    # outputs (all lane-dense, last dim 128)
    logits_ref, ff_act_ref, ff_out_ref,
):
    scale = 1.0 / math.sqrt(HEAD_DIM)

    def ln(x, g, b):
        mu = jnp.mean(x, axis=-1, keepdims=True)
        var = jnp.mean(jnp.square(x - mu), axis=-1, keepdims=True)
        return (x - mu) * jax.lax.rsqrt(var + LN_EPS) * g + b

    def mm(a, w):
        # TODO(synk): at real sizes cast operands to bf16 (keep f32 accum) for
        # full-rate MXU on v6e/v7x; irrelevant at this toy size.
        return jnp.dot(a, w, preferred_element_type=jnp.float32)

    gvec = vec_global_ref[...]                              # (8, 128)
    mask = mask_ref[...]                                    # (M, M) additive

    hidden = ln(emb_ref[...].astype(jnp.float32),
                gvec[0:1, :HIDDEN], gvec[1:2, :HIDDEN])     # (M, HIDDEN)
    # embeddings dropout: identity (eval mode)

    for l in range(N_LAYERS):
        vec = vec_layer_ref[l]                              # (8, 128)
        bo        = vec[0:1, :HIDDEN]
        attn_ln_g = vec[1:2, :HIDDEN]
        attn_ln_b = vec[2:3, :HIDDEN]
        bi_pad    = vec[3:4, :]                             # lanes 64:128 = 0
        bo2_pad   = vec[4:5, :]                             # lanes 32:128 = 0
        out_ln_g  = vec[5:6, :HIDDEN]
        out_ln_b  = vec[6:7, :HIDDEN]

        # ---- self attention: fused QKV projection, per-head softmax ----
        w_slab = w_qkvo_ref[l]                              # (HIDDEN, 128)
        qkv = mm(hidden, w_slab) + b_qkv_ref[l]             # (M, 128)
        ctx_heads = []
        for h in range(N_HEADS):
            lo = h * HEAD_DIM
            qh = qkv[:, lo:lo + HEAD_DIM]                   # (M, dh)
            kh = qkv[:, HIDDEN + lo:HIDDEN + lo + HEAD_DIM]
            vh = qkv[:, 2 * HIDDEN + lo:2 * HIDDEN + lo + HEAD_DIM]
            s = mm(qh, kh.T) * scale + mask                 # (M, M)
            s = s - jnp.max(s, axis=-1, keepdims=True)
            p = jnp.exp(s)
            p = p * pl.reciprocal(jnp.sum(p, axis=-1, keepdims=True),
                                  approx=True)
            ctx_heads.append(mm(p, vh))                     # (M, dh)
        ctx = jnp.concatenate(ctx_heads, axis=-1)           # (M, HIDDEN)
        wo = w_slab[:, 3 * HIDDEN:]                         # (HIDDEN, HIDDEN)
        attn_proj = mm(ctx, wo) + bo
        # self-output dropout: identity (eval)
        attention_output = ln(attn_proj + hidden, attn_ln_g, attn_ln_b)

        # ---- feed forward (probed tensors, lane-dense padded math) ----
        ff_act_full = _gelu(mm(attention_output, w_ffi_ref[l]) + bi_pad)  # (M,128)
        ff_out_full = mm(ff_act_full, w_ffo_ref[l]) + bo2_pad             # (M,128)
        ff_act_ref[l] = ff_act_full.astype(ff_act_ref.dtype)
        ff_out_ref[l] = ff_out_full.astype(ff_out_ref.dtype)
        # output dropout: identity (eval)
        hidden = ln(ff_out_full[:, :HIDDEN] + attention_output,
                    out_ln_g, out_ln_b)

    # ---- MLM cls head: transform (dense + gelu + LN) then decoder ----
    w_head = w_head_ref[...]                                # (64, 128)
    cls_w = w_head[:HIDDEN, :HIDDEN]                        # (32, 32)
    dec_w = w_head[HIDDEN:2 * HIDDEN, :]                    # (32, 128)
    h = _gelu(mm(hidden, cls_w) + gvec[2:3, :HIDDEN])
    h = ln(h, gvec[3:4, :HIDDEN], gvec[4:5, :HIDDEN])
    logits = mm(h, dec_w) + gvec[5:6, :]                    # (M, 128)
    logits_ref[...] = logits.astype(logits_ref.dtype)


# ------------------------------ parameters -----------------------------------
def init_params(key):
    keys = iter(jax.random.split(key, 64))

    def w(shape):
        return jax.random.normal(next(keys), shape, jnp.float32) * 0.02

    params = {
        "word_emb": w((VOCAB, HIDDEN)),
        "pos_emb": w((MAX_POS, HIDDEN)),
        "type_emb": w((TYPE_VOCAB, HIDDEN)),
        "emb_ln_g": jnp.ones((HIDDEN,), jnp.float32),
        "emb_ln_b": jnp.zeros((HIDDEN,), jnp.float32),
        "layers": [],
        "cls_w": w((HIDDEN, HIDDEN)),
        "cls_b": jnp.zeros((HIDDEN,), jnp.float32),
        "cls_ln_g": jnp.ones((HIDDEN,), jnp.float32),
        "cls_ln_b": jnp.zeros((HIDDEN,), jnp.float32),
        "dec_w": w((HIDDEN, VOCAB)),
        "dec_b": jnp.zeros((VOCAB,), jnp.float32),
    }
    for _ in range(N_LAYERS):
        params["layers"].append({
            "wq": w((HIDDEN, HIDDEN)), "bq": jnp.zeros((HIDDEN,), jnp.float32),
            "wk": w((HIDDEN, HIDDEN)), "bk": jnp.zeros((HIDDEN,), jnp.float32),
            "wv": w((HIDDEN, HIDDEN)), "bv": jnp.zeros((HIDDEN,), jnp.float32),
            "wo": w((HIDDEN, HIDDEN)), "bo": jnp.zeros((HIDDEN,), jnp.float32),
            "attn_ln_g": jnp.ones((HIDDEN,), jnp.float32),
            "attn_ln_b": jnp.zeros((HIDDEN,), jnp.float32),
            "wi": w((HIDDEN, INTERMEDIATE)),
            "bi": jnp.zeros((INTERMEDIATE,), jnp.float32),
            "wo2": w((INTERMEDIATE, HIDDEN)),
            "bo2": jnp.zeros((HIDDEN,), jnp.float32),
            "out_ln_g": jnp.ones((HIDDEN,), jnp.float32),
            "out_ln_b": jnp.zeros((HIDDEN,), jnp.float32),
        })
    return params


def pack_params(params):
    """One-shot (init-time) re-packing of weights into 128-lane-dense slabs."""
    layers = params["layers"]

    def pad_lane(x):          # pad last dim of a 2-D array to 128 lanes
        return jnp.pad(x, ((0, 0), (0, LANE - x.shape[-1])))

    def row(v):               # pad a 1-D vector to one 128-lane row
        return jnp.pad(v, (0, LANE - v.shape[0])).reshape(1, LANE)

    w_qkvo = jnp.stack([
        jnp.concatenate([l["wq"], l["wk"], l["wv"], l["wo"]], axis=1)
        for l in layers])                                    # (L, 32, 128)
    b_qkv = jnp.stack([
        jnp.concatenate([l["bq"], l["bk"], l["bv"],
                         jnp.zeros((HIDDEN,), jnp.float32)]).reshape(1, LANE)
        for l in layers])                                    # (L, 1, 128)
    w_ffi = jnp.stack([pad_lane(l["wi"]) for l in layers])   # (L, 32, 128)
    w_ffo = jnp.stack([
        jnp.pad(l["wo2"], ((0, LANE - INTERMEDIATE), (0, LANE - HIDDEN)))
        for l in layers])                                    # (L, 128, 128)
    vec_layer = jnp.stack([
        jnp.concatenate([
            row(l["bo"]), row(l["attn_ln_g"]), row(l["attn_ln_b"]),
            row(l["bi"]), row(l["bo2"]), row(l["out_ln_g"]), row(l["out_ln_b"]),
            jnp.zeros((1, LANE), jnp.float32)], axis=0)
        for l in layers])                                    # (L, 8, 128)
    w_head = jnp.concatenate([pad_lane(params["cls_w"]),
                              pad_lane(params["dec_w"])], axis=0)   # (64, 128)
    vec_global = jnp.concatenate([
        row(params["emb_ln_g"]), row(params["emb_ln_b"]),
        row(params["cls_b"]), row(params["cls_ln_g"]), row(params["cls_ln_b"]),
        row(params["dec_b"]),
        jnp.zeros((2, LANE), jnp.float32)], axis=0)          # (8, 128)

    return {
        "word_emb": params["word_emb"],
        "pos_emb": params["pos_emb"],
        "type_emb": params["type_emb"],
        "w_qkvo": w_qkvo, "b_qkv": b_qkv,
        "w_ffi": w_ffi, "w_ffo": w_ffo, "vec_layer": vec_layer,
        "w_head": w_head, "vec_global": vec_global,
    }


# ------------------------------- forward -------------------------------------
def bert_forward(packed, input_ids, attention_mask, token_type_ids):
    Bq, Tq = input_ids.shape
    Mq = Bq * Tq

    # Embeddings: word + position + token_type (gather = JAX glue).
    emb = (packed["word_emb"][input_ids]
           + packed["pos_emb"][jnp.arange(Tq)][None, :, :]
           + packed["type_emb"][token_type_ids]).reshape(Mq, HIDDEN)

    # Block-diagonal extended attention mask over flattened rows:
    #   allowed iff same batch AND key token is not padding.
    batch_idx = jnp.repeat(jnp.arange(Bq), Tq)
    same_batch = batch_idx[:, None] == batch_idx[None, :]
    key_valid = attention_mask.reshape(Mq) > 0
    mask_full = jnp.where(same_batch & key_valid[None, :], 0.0,
                          MASK_NEG).astype(jnp.float32)

    out_shape = (
        jax.ShapeDtypeStruct((Mq, LANE), jnp.float32),             # logits
        jax.ShapeDtypeStruct((N_LAYERS, Mq, LANE), jnp.float32),   # ff_act
        jax.ShapeDtypeStruct((N_LAYERS, Mq, LANE), jnp.float32),   # ff_out
    )
    logits_pad, ff_act_pad, ff_out_pad = pl.pallas_call(
        _bert_fused_kernel,
        out_shape=out_shape,
        in_specs=[_VMEM] * 9,
        out_specs=(_VMEM, _VMEM, _VMEM),
    )(emb, mask_full,
      packed["w_qkvo"], packed["b_qkv"], packed["w_ffi"], packed["w_ffo"],
      packed["vec_layer"], packed["w_head"], packed["vec_global"])

    logits = logits_pad[:, :VOCAB].reshape(Bq, Tq, VOCAB)
    ff_act_list = [ff_act_pad[l, :, :INTERMEDIATE].reshape(Bq, Tq, INTERMEDIATE)
                   for l in range(N_LAYERS)]
    ff_out_list = [ff_out_pad[l, :, :HIDDEN].reshape(Bq, Tq, HIDDEN)
                   for l in range(N_LAYERS)]
    return logits, ff_act_list, ff_out_list


# --------------------------------- main ---------------------------------------
if __name__ == "__main__":
    root = jax.random.PRNGKey(0)
    pkey, ikey = jax.random.split(root)
    params = init_params(pkey)
    packed = pack_params(params)          # hoisted out of the jitted forward

    k_ids, _ = jax.random.split(ikey)
    input_ids = jax.random.randint(k_ids, (B, T), 5, VOCAB, dtype=jnp.int32)
    input_ids = input_ids.at[0, 3].set(MASK_TOKEN_ID).at[1, 5].set(MASK_TOKEN_ID)
    attention_mask = jnp.ones((B, T), jnp.int32).at[1, 6:].set(0)
    token_type_ids = jnp.zeros((B, T), jnp.int32)

    fwd = jax.jit(bert_forward)
    logits, ff_act, ff_out = fwd(packed, input_ids, attention_mask,
                                 token_type_ids)
    jax.block_until_ready((logits, ff_act, ff_out))

    # mask_index extraction (dynamic-shape nonzero -> host-side Python, like the
    # original module's python loop).
    ids_np = np.asarray(input_ids)
    mask_index = [[j for j in range(T) if ids_np[i, j] == MASK_TOKEN_ID]
                  for i in range(B)]

    output = {"logits": logits, "ff_act": ff_act, "ff_out": ff_out,
              "mask_index": mask_index}

    assert output["logits"].shape == (B, T, VOCAB)
    assert len(output["ff_act"]) == N_LAYERS
    assert output["ff_act"][0].shape == (B, T, INTERMEDIATE)
    assert output["ff_out"][0].shape == (B, T, HIDDEN)
    assert bool(jnp.all(jnp.isfinite(output["logits"])))

    print("KERNEL_OK")
</pallas_src>

<mosaic_0001>
module attributes {stable_mosaic.version = 11 : i64} {
  func.func @_bert_fused_kernel(%arg0: memref<16x32xf32, #tpu.memory_space<vmem>>, %arg1: memref<16x16xf32, #tpu.memory_space<vmem>>, %arg2: memref<2x32x128xf32, #tpu.memory_space<vmem>>, %arg3: memref<2x1x128xf32, #tpu.memory_space<vmem>>, %arg4: memref<2x32x128xf32, #tpu.memory_space<vmem>>, %arg5: memref<2x128x128xf32, #tpu.memory_space<vmem>>, %arg6: memref<2x8x128xf32, #tpu.memory_space<vmem>>, %arg7: memref<64x128xf32, #tpu.memory_space<vmem>>, %arg8: memref<8x128xf32, #tpu.memory_space<vmem>>, %arg9: memref<16x128xf32, #tpu.memory_space<vmem>>, %arg10: memref<2x16x128xf32, #tpu.memory_space<vmem>>, %arg11: memref<2x16x128xf32, #tpu.memory_space<vmem>>) attributes {dimension_semantics = [], scalar_prefetch = 0 : i64, scratch_operands = 0 : i64, tpu.core_type = #tpu.core_type<tc>} {
    %c0 = arith.constant 0 : index
    %c0_0 = arith.constant 0 : index
    %0 = vector.load %arg8[%c0, %c0_0] : memref<8x128xf32, #tpu.memory_space<vmem>>, vector<8x128xf32>
    %c0_1 = arith.constant 0 : index
    %c0_2 = arith.constant 0 : index
    %1 = vector.load %arg1[%c0_1, %c0_2] : memref<16x16xf32, #tpu.memory_space<vmem>>, vector<16x16xf32>
    %c0_3 = arith.constant 0 : index
    %c0_4 = arith.constant 0 : index
    %2 = vector.load %arg0[%c0_3, %c0_4] : memref<16x32xf32, #tpu.memory_space<vmem>>, vector<16x32xf32>
    %3 = vector.extract_strided_slice %0 {offsets = [0, 0], sizes = [1, 32], strides = [1, 1]} : vector<8x128xf32> to vector<1x32xf32>
    %4 = vector.extract_strided_slice %0 {offsets = [1, 0], sizes = [1, 32], strides = [1, 1]} : vector<8x128xf32> to vector<1x32xf32>
    %cst = arith.constant dense<0.000000e+00> : vector<16xf32>
    %5 = vector.multi_reduction <add>, %2, %cst [1] : vector<16x32xf32> to vector<16xf32>
    %6 = vector.shape_cast %5 : vector<16xf32> to vector<16x1xf32>
    %cst_5 = arith.constant 3.200000e+01 : f32
    %7 = vector.broadcast %cst_5 : f32 to vector<16x1xf32>
    %8 = arith.divf %6, %7 : vector<16x1xf32>
    %9 = vector.broadcast %8 : vector<16x1xf32> to vector<16x32xf32>
    %10 = arith.subf %2, %9 : vector<16x32xf32>
    %11 = arith.mulf %10, %10 : vector<16x32xf32>
    %cst_6 = arith.constant dense<0.000000e+00> : vector<16xf32>
    %12 = vector.multi_reduction <add>, %11, %cst_6 [1] : vector<16x32xf32> to vector<16xf32>
    %13 = vector.shape_cast %12 : vector<16xf32> to vector<16x1xf32>
    %cst_7 = arith.constant 3.200000e+01 : f32
    %14 = vector.broadcast %cst_7 : f32 to vector<16x1xf32>
    %15 = arith.divf %13, %14 : vector<16x1xf32>
    %16 = vector.broadcast %8 : vector<16x1xf32> to vector<16x32xf32>
    %17 = arith.subf %2, %16 : vector<16x32xf32>
    %cst_8 = arith.constant 9.99999996E-13 : f32
    %18 = vector.broadcast %cst_8 : f32 to vector<16x1xf32>
    %19 = arith.addf %15, %18 : vector<16x1xf32>
    %20 = math.rsqrt %19 : vector<16x1xf32>
    %21 = vector.broadcast %20 : vector<16x1xf32> to vector<16x32xf32>
    %22 = arith.mulf %17, %21 : vector<16x32xf32>
    %23 = vector.broadcast %3 : vector<1x32xf32> to vector<16x32xf32>
    %24 = arith.mulf %22, %23 : vector<16x32xf32>
    %25 = vector.broadcast %4 : vector<1x32xf32> to vector<16x32xf32>
    %26 = arith.addf %24, %25 : vector<16x32xf32>
    %c0_9 = arith.constant 0 : index
    %c0_10 = arith.constant 0 : index
    %c0_11 = arith.constant 0 : index
    %27 = vector.load %arg6[%c0_9, %c0_10, %c0_11] : memref<2x8x128xf32, #tpu.memory_space<vmem>>, vector<1x8x128xf32>
    %28 = vector.shape_cast %27 : vector<1x8x128xf32> to vector<8x128xf32>
    %29 = vector.extract_strided_slice %28 {offsets = [0, 0], sizes = [1, 32], strides = [1, 1]} : vector<8x128xf32> to vector<1x32xf32>
    %30 = vector.extract_strided_slice %28 {offsets = [1, 0], sizes = [1, 32], strides = [1, 1]} : vector<8x128xf32> to vector<1x32xf32>
    %31 = vector.extract_strided_slice %28 {offsets = [2, 0], sizes = [1, 32], strides = [1, 1]} : vector<8x128xf32> to vector<1x32xf32>
    %32 = vector.extract_strided_slice %28 {offsets = [3, 0], sizes = [1, 128], strides = [1, 1]} : vector<8x128xf32> to vector<1x128xf32>
    %33 = vector.extract_strided_slice %28 {offsets = [4, 0], sizes = [1, 128], strides = [1, 1]} : vector<8x128xf32> to vector<1x128xf32>
    %34 = vector.extract_strided_slice %28 {offsets = [5, 0], sizes = [1, 32], strides = [1, 1]} : vector<8x128xf32> to vector<1x32xf32>
    %35 = vector.extract_strided_slice %28 {offsets = [6, 0], sizes = [1, 32], strides = [1, 1]} : vector<8x128xf32> to vector<1x32xf32>
    %c0_12 = arith.constant 0 : index
    %c0_13 = arith.constant 0 : index
    %c0_14 = arith.constant 0 : index
    %36 = vector.load %arg2[%c0_12, %c0_13, %c0_14] : memref<2x32x128xf32, #tpu.memory_space<vmem>>, vector<1x32x128xf32>
    %37 = vector.shape_cast %36 : vector<1x32x128xf32> to vector<32x128xf32>
    %cst_15 = arith.constant dense<0.000000e+00> : vector<16x128xf32>
    %38 = tpu.matmul %26, %37, %cst_15 {dimension_numbers = #tpu.dot_dimension_numbers<[1], [0], [0], [1], [0, 0, 1, 1], [], []>} : vector<16x32xf32>, vector<32x128xf32>, vector<16x128xf32> -> vector<16x128xf32>
    %c0_16 = arith.constant 0 : index
    %c0_17 = arith.constant 0 : index
    %c0_18 = arith.constant 0 : index
    %39 = vector.load %arg3[%c0_16, %c0_17, %c0_18] : memref<2x1x128xf32, #tpu.memory_space<vmem>>, vector<1x1x128xf32>
    %40 = vector.shape_cast %39 : vector<1x1x128xf32> to vector<1x128xf32>
    %41 = vector.broadcast %40 : vector<1x128xf32> to vector<16x128xf32>
    %42 = arith.addf %38, %41 : vector<16x128xf32>
    %43 = vector.extract_strided_slice %42 {offsets = [0, 0], sizes = [16, 8], strides = [1, 1]} : vector<16x128xf32> to vector<16x8xf32>
    %44 = vector.extract_strided_slice %42 {offsets = [0, 32], sizes = [16, 8], strides = [1, 1]} : vector<16x128xf32> to vector<16x8xf32>
    %45 = vector.extract_strided_slice %42 {offsets = [0, 64], sizes = [16, 8], strides = [1, 1]} : vector<16x128xf32> to vector<16x8xf32>
    %46 = tpu.transpose %44, [1, 0] : vector<16x8xf32> -> vector<8x16xf32>
    %cst_19 = arith.constant dense<0.000000e+00> : vector<16x16xf32>
    %47 = tpu.matmul %43, %46, %cst_19 {dimension_numbers = #tpu.dot_dimension_numbers<[1], [0], [0], [1], [0, 0, 1, 1], [], []>} : vector<16x8xf32>, vector<8x16xf32>, vector<16x16xf32> -> vector<16x16xf32>
    %cst_20 = arith.constant 0.353553385 : f32
    %48 = vector.broadcast %cst_20 : f32 to vector<16x16xf32>
    %49 = arith.mulf %47, %48 : vector<16x16xf32>
    %50 = arith.addf %49, %1 : vector<16x16xf32>
    %cst_21 = arith.constant dense<0xFF800000> : vector<16xf32>
    %51 = vector.multi_reduction <maximumf>, %50, %cst_21 [1] : vector<16x16xf32> to vector<16xf32>
    %52 = vector.shape_cast %51 : vector<16xf32> to vector<16x1xf32>
    %53 = vector.broadcast %52 : vector<16x1xf32> to vector<16x16xf32>
    %54 = arith.subf %50, %53 : vector<16x16xf32>
    %55 = math.exp %54 : vector<16x16xf32>
    %cst_22 = arith.constant dense<0.000000e+00> : vector<16xf32>
    %56 = vector.multi_reduction <add>, %55, %cst_22 [1] : vector<16x16xf32> to vector<16xf32>
    %57 = vector.shape_cast %56 : vector<16xf32> to vector<16x1xf32>
    %58 = tpu.reciprocal %57 {approx = true} : vector<16x1xf32> -> vector<16x1xf32>
    %59 = vector.broadcast %58 : vector<16x1xf32> to vector<16x16xf32>
    %60 = arith.mulf %55, %59 : vector<16x16xf32>
    %cst_23 = arith.constant dense<0.000000e+00> : vector<16x8xf32>
    %61 = tpu.matmul %60, %45, %cst_23 {dimension_numbers = #tpu.dot_dimension_numbers<[1], [0], [0], [1], [0, 0, 1, 1], [], []>} : vector<16x16xf32>, vector<16x8xf32>, vector<16x8xf32> -> vector<16x8xf32>
    %62 = vector.extract_strided_slice %42 {offsets = [0, 8], sizes = [16, 8], strides = [1, 1]} : vector<16x128xf32> to vector<16x8xf32>
    %63 = vector.extract_strided_slice %42 {offsets = [0, 40], sizes = [16, 8], strides = [1, 1]} : vector<16x128xf32> to vector<16x8xf32>
    %64 = vector.extract_strided_slice %42 {offsets = [0, 72], sizes = [16, 8], strides = [1, 1]} : vector<16x128xf32> to vector<16x8xf32>
    %65 = tpu.transpose %63, [1, 0] : vector<16x8xf32> -> vector<8x16xf32>
    %cst_24 = arith.constant dense<0.000000e+00> : vector<16x16xf32>
    %66 = tpu.matmul %62, %65, %cst_24 {dimension_numbers = #tpu.dot_dimension_numbers<[1], [0], [0], [1], [0, 0, 1, 1], [], []>} : vector<16x8xf32>, vector<8x16xf32>, vector<16x16xf32> -> vector<16x16xf32>
    %cst_25 = arith.constant 0.353553385 : f32
    %67 = vector.broadcast %cst_25 : f32 to vector<16x16xf32>
    %68 = arith.mulf %66, %67 : vector<16x16xf32>
    %69 = arith.addf %68, %1 : vector<16x16xf32>
    %cst_26 = arith.constant dense<0xFF800000> : vector<16xf32>
    %70 = vector.multi_reduction <maximumf>, %69, %cst_26 [1] : vector<16x16xf32> to vector<16xf32>
    %71 = vector.shape_cast %70 : vector<16xf32> to vector<16x1xf32>
    %72 = vector.broadcast %71 : vector<16x1xf32> to vector<16x16xf32>
    %73 = arith.subf %69, %72 : vector<16x16xf32>
    %74 = math.exp %73 : vector<16x16xf32>
    %cst_27 = arith.constant dense<0.000000e+00> : vector<16xf32>
    %75 = vector.multi_reduction <add>, %74, %cst_27 [1] : vector<16x16xf32> to vector<16xf32>
    %76 = vector.shape_cast %75 : vector<16xf32> to vector<16x1xf32>
    %77 = tpu.reciprocal %76 {approx = true} : vector<16x1xf32> -> vector<16x1xf32>
    %78 = vector.broadcast %77 : vector<16x1xf32> to vector<16x16xf32>
    %79 = arith.mulf %74, %78 : vector<16x16xf32>
    %cst_28 = arith.constant dense<0.000000e+00> : vector<16x8xf32>
    %80 = tpu.matmul %79, %64, %cst_28 {dimension_numbers = #tpu.dot_dimension_numbers<[1], [0], [0], [1], [0, 0, 1, 1], [], []>} : vector<16x16xf32>, vector<16x8xf32>, vector<16x8xf32> -> vector<16x8xf32>
    %81 = vector.extract_strided_slice %42 {offsets = [0, 16], sizes = [16, 8], strides = [1, 1]} : vector<16x128xf32> to vector<16x8xf32>
    %82 = vector.extract_strided_slice %42 {offsets = [0, 48], sizes = [16, 8], strides = [1, 1]} : vector<16x128xf32> to vector<16x8xf32>
    %83 = vector.extract_strided_slice %42 {offsets = [0, 80], sizes = [16, 8], strides = [1, 1]} : vector<16x128xf32> to vector<16x8xf32>
    %84 = tpu.transpose %82, [1, 0] : vector<16x8xf32> -> vector<8x16xf32>
    %cst_29 = arith.constant dense<0.000000e+00> : vector<16x16xf32>
    %85 = tpu.matmul %81, %84, %cst_29 {dimension_numbers = #tpu.dot_dimension_numbers<[1], [0], [0], [1], [0, 0, 1, 1], [], []>} : vector<16x8xf32>, vector<8x16xf32>, vector<16x16xf32> -> vector<16x16xf32>
    %cst_30 = arith.constant 0.353553385 : f32
    %86 = vector.broadcast %cst_30 : f32 to vector<16x16xf32>
    %87 = arith.mulf %85, %86 : vector<16x16xf32>
    %88 = arith.addf %87, %1 : vector<16x16xf32>
    %cst_31 = arith.constant dense<0xFF800000> : vector<16xf32>
    %89 = vector.multi_reduction <maximumf>, %88, %cst_31 [1] : vector<16x16xf32> to vector<16xf32>
    %90 = vector.shape_cast %89 : vector<16xf32> to vector<16x1xf32>
    %91 = vector.broadcast %90 : vector<16x1xf32> to vector<16x16xf32>
    %92 = arith.subf %88, %91 : vector<16x16xf32>
    %93 = math.exp %92 : vector<16x16xf32>
    %cst_32 = arith.constant dense<0.000000e+00> : vector<16xf32>
    %94 = vector.multi_reduction <add>, %93, %cst_32 [1] : vector<16x16xf32> to vector<16xf32>
    %95 = vector.shape_cast %94 : vector<16xf32> to vector<16x1xf32>
    %96 = tpu.reciprocal %95 {approx = true} : vector<16x1xf32> -> vector<16x1xf32>
    %97 = vector.broadcast %96 : vector<16x1xf32> to vector<16x16xf32>
    %98 = arith.mulf %93, %97 : vector<16x16xf32>
    %cst_33 = arith.constant dense<0.000000e+00> : vector<16x8xf32>
    %99 = tpu.matmul %98, %83, %cst_33 {dimension_numbers = #tpu.dot_dimension_numbers<[1], [0], [0], [1], [0, 0, 1, 1], [], []>} : vector<16x16xf32>, vector<16x8xf32>, vector<16x8xf32> -> vector<16x8xf32>
    %100 = vector.extract_strided_slice %42 {offsets = [0, 24], sizes = [16, 8], strides = [1, 1]} : vector<16x128xf32> to vector<16x8xf32>
    %101 = vector.extract_strided_slice %42 {offsets = [0, 56], sizes = [16, 8], strides = [1, 1]} : vector<16x128xf32> to vector<16x8xf32>
    %102 = vector.extract_strided_slice %42 {offsets = [0, 88], sizes = [16, 8], strides = [1, 1]} : vector<16x128xf32> to vector<16x8xf32>
    %103 = tpu.transpose %101, [1, 0] : vector<16x8xf32> -> vector<8x16xf32>
    %cst_34 = arith.constant dense<0.000000e+00> : vector<16x16xf32>
    %104 = tpu.matmul %100, %103, %cst_34 {dimension_numbers = #tpu.dot_dimension_numbers<[1], [0], [0], [1], [0, 0, 1, 1], [], []>} : vector<16x8xf32>, vector<8x16xf32>, vector<16x16xf32> -> vector<16x16xf32>
    %cst_35 = arith.constant 0.353553385 : f32
    %105 = vector.broadcast %cst_35 : f32 to vector<16x16xf32>
    %106 = arith.mulf %104, %105 : vector<16x16xf32>
    %107 = arith.addf %106, %1 : vector<16x16xf32>
    %cst_36 = arith.constant dense<0xFF800000> : vector<16xf32>
    %108 = vector.multi_reduction <maximumf>, %107, %cst_36 [1] : vector<16x16xf32> to vector<16xf32>
    %109 = vector.shape_cast %108 : vector<16xf32> to vector<16x1xf32>
    %110 = vector.broadcast %109 : vector<16x1xf32> to vector<16x16xf32>
    %111 = arith.subf %107, %110 : vector<16x16xf32>
    %112 = math.exp %111 : vector<16x16xf32>
    %cst_37 = arith.constant dense<0.000000e+00> : vector<16xf32>
    %113 = vector.multi_reduction <add>, %112, %cst_37 [1] : vector<16x16xf32> to vector<16xf32>
    %114 = vector.shape_cast %113 : vector<16xf32> to vector<16x1xf32>
    %115 = tpu.reciprocal %114 {approx = true} : vector<16x1xf32> -> vector<16x1xf32>
    %116 = vector.broadcast %115 : vector<16x1xf32> to vector<16x16xf32>
    %117 = arith.mulf %112, %116 : vector<16x16xf32>
    %cst_38 = arith.constant dense<0.000000e+00> : vector<16x8xf32>
    %118 = tpu.matmul %117, %102, %cst_38 {dimension_numbers = #tpu.dot_dimension_numbers<[1], [0], [0], [1], [0, 0, 1, 1], [], []>} : vector<16x16xf32>, vector<16x8xf32>, vector<16x8xf32> -> vector<16x8xf32>
    %119 = tpu.concatenate %61, %80, %99, %118 in 1 : vector<16x8xf32>, vector<16x8xf32>, vector<16x8xf32>, vector<16x8xf32> -> vector<16x32xf32>
    %120 = vector.extract_strided_slice %37 {offsets = [0, 96], sizes = [32, 32], strides = [1, 1]} : vector<32x128xf32> to vector<32x32xf32>
    %cst_39 = arith.constant dense<0.000000e+00> : vector<16x32xf32>
    %121 = tpu.matmul %119, %120, %cst_39 {dimension_numbers = #tpu.dot_dimension_numbers<[1], [0], [0], [1], [0, 0, 1, 1], [], []>} : vector<16x32xf32>, vector<32x32xf32>, vector<16x32xf32> -> vector<16x32xf32>
    %122 = vector.broadcast %29 : vector<1x32xf32> to vector<16x32xf32>
    %123 = arith.addf %121, %122 : vector<16x32xf32>
    %124 = arith.addf %123, %26 : vector<16x32xf32>
    %cst_40 = arith.constant dense<0.000000e+00> : vector<16xf32>
    %125 = vector.multi_reduction <add>, %124, %cst_40 [1] : vector<16x32xf32> to vector<16xf32>
    %126 = vector.shape_cast %125 : vector<16xf32> to vector<16x1xf32>
    %cst_41 = arith.constant 3.200000e+01 : f32
    %127 = vector.broadcast %cst_41 : f32 to vector<16x1xf32>
    %128 = arith.divf %126, %127 : vector<16x1xf32>
    %129 = vector.broadcast %128 : vector<16x1xf32> to vector<16x32xf32>
    %130 = arith.subf %124, %129 : vector<16x32xf32>
    %131 = arith.mulf %130, %130 : vector<16x32xf32>
    %cst_42 = arith.constant dense<0.000000e+00> : vector<16xf32>
    %132 = vector.multi_reduction <add>, %131, %cst_42 [1] : vector<16x32xf32> to vector<16xf32>
    %133 = vector.shape_cast %132 : vector<16xf32> to vector<16x1xf32>
    %cst_43 = arith.constant 3.200000e+01 : f32
    %134 = vector.broadcast %cst_43 : f32 to vector<16x1xf32>
    %135 = arith.divf %133, %134 : vector<16x1xf32>
    %136 = vector.broadcast %128 : vector<16x1xf32> to vector<16x32xf32>
    %137 = arith.subf %124, %136 : vector<16x32xf32>
    %cst_44 = arith.constant 9.99999996E-13 : f32
    %138 = vector.broadcast %cst_44 : f32 to vector<16x1xf32>
    %139 = arith.addf %135, %138 : vector<16x1xf32>
    %140 = math.rsqrt %139 : vector<16x1xf32>
    %141 = vector.broadcast %140 : vector<16x1xf32> to vector<16x32xf32>
    %142 = arith.mulf %137, %141 : vector<16x32xf32>
    %143 = vector.broadcast %30 : vector<1x32xf32> to vector<16x32xf32>
    %144 = arith.mulf %142, %143 : vector<16x32xf32>
    %145 = vector.broadcast %31 : vector<1x32xf32> to vector<16x32xf32>
    %146 = arith.addf %144, %145 : vector<16x32xf32>
    %c0_45 = arith.constant 0 : index
    %c0_46 = arith.constant 0 : index
    %c0_47 = arith.constant 0 : index
    %147 = vector.load %arg4[%c0_45, %c0_46, %c0_47] : memref<2x32x128xf32, #tpu.memory_space<vmem>>, vector<1x32x128xf32>
    %148 = vector.shape_cast %147 : vector<1x32x128xf32> to vector<32x128xf32>
    %cst_48 = arith.constant dense<0.000000e+00> : vector<16x128xf32>
    %149 = tpu.matmul %146, %148, %cst_48 {dimension_numbers = #tpu.dot_dimension_numbers<[1], [0], [0], [1], [0, 0, 1, 1], [], []>} : vector<16x32xf32>, vector<32x128xf32>, vector<16x128xf32> -> vector<16x128xf32>
    %150 = vector.broadcast %32 : vector<1x128xf32> to vector<16x128xf32>
    %151 = arith.addf %149, %150 : vector<16x128xf32>
    %152 = arith.mulf %151, %151 : vector<16x128xf32>
    %153 = arith.mulf %151, %152 : vector<16x128xf32>
    %cst_49 = arith.constant 4.471500e-02 : f32
    %154 = vector.broadcast %cst_49 : f32 to vector<16x128xf32>
    %155 = arith.mulf %154, %153 : vector<16x128xf32>
    %156 = arith.addf %151, %155 : vector<16x128xf32>
    %cst_50 = arith.constant 0.797884583 : f32
    %157 = vector.broadcast %cst_50 : f32 to vector<16x128xf32>
    %158 = arith.mulf %157, %156 : vector<16x128xf32>
    %159 = math.tanh %158 : vector<16x128xf32>
    %cst_51 = arith.constant 1.000000e+00 : f32
    %160 = vector.broadcast %cst_51 : f32 to vector<16x128xf32>
    %161 = arith.addf %160, %159 : vector<16x128xf32>
    %cst_52 = arith.constant 5.000000e-01 : f32
    %162 = vector.broadcast %cst_52 : f32 to vector<16x128xf32>
    %163 = arith.mulf %162, %161 : vector<16x128xf32>
    %164 = arith.mulf %151, %163 : vector<16x128xf32>
    %c0_53 = arith.constant 0 : index
    %c0_54 = arith.constant 0 : index
    %c0_55 = arith.constant 0 : index
    %165 = vector.load %arg5[%c0_53, %c0_54, %c0_55] : memref<2x128x128xf32, #tpu.memory_space<vmem>>, vector<1x128x128xf32>
    %166 = vector.shape_cast %165 : vector<1x128x128xf32> to vector<128x128xf32>
    %cst_56 = arith.constant dense<0.000000e+00> : vector<16x128xf32>
    %167 = tpu.matmul %164, %166, %cst_56 {dimension_numbers = #tpu.dot_dimension_numbers<[1], [0], [0], [1], [0, 0, 1, 1], [], []>} : vector<16x128xf32>, vector<128x128xf32>, vector<16x128xf32> -> vector<16x128xf32>
    %168 = vector.broadcast %33 : vector<1x128xf32> to vector<16x128xf32>
    %169 = arith.addf %167, %168 : vector<16x128xf32>
    %c0_57 = arith.constant 0 : index
    %c0_58 = arith.constant 0 : index
    %c0_59 = arith.constant 0 : index
    %170 = vector.load %arg10[%c0_57, %c0_58, %c0_59] : memref<2x16x128xf32, #tpu.memory_space<vmem>>, vector<1x16x128xf32>
    %171 = vector.shape_cast %170 : vector<1x16x128xf32> to vector<16x128xf32>
    %172 = vector.shape_cast %164 : vector<16x128xf32> to vector<1x16x128xf32>
    tpu.vector_store %arg10[%c0_57, %c0_58, %c0_59], %172 {strides = array<i32>} : memref<2x16x128xf32, #tpu.memory_space<vmem>>, vector<1x16x128xf32>,
    %c0_60 = arith.constant 0 : index
    %c0_61 = arith.constant 0 : index
    %c0_62 = arith.constant 0 : index
    %173 = vector.load %arg11[%c0_60, %c0_61, %c0_62] : memref<2x16x128xf32, #tpu.memory_space<vmem>>, vector<1x16x128xf32>
    %174 = vector.shape_cast %173 : vector<1x16x128xf32> to vector<16x128xf32>
    %175 = vector.shape_cast %169 : vector<16x128xf32> to vector<1x16x128xf32>
    tpu.vector_store %arg11[%c0_60, %c0_61, %c0_62], %175 {strides = array<i32>} : memref<2x16x128xf32, #tpu.memory_space<vmem>>, vector<1x16x128xf32>,
    %176 = vector.extract_strided_slice %169 {offsets = [0, 0], sizes = [16, 32], strides = [1, 1]} : vector<16x128xf32> to vector<16x32xf32>
    %177 = arith.addf %176, %146 : vector<16x32xf32>
    %cst_63 = arith.constant dense<0.000000e+00> : vector<16xf32>
    %178 = vector.multi_reduction <add>, %177, %cst_63 [1] : vector<16x32xf32> to vector<16xf32>
    %179 = vector.shape_cast %178 : vector<16xf32> to vector<16x1xf32>
    %cst_64 = arith.constant 3.200000e+01 : f32
    %180 = vector.broadcast %cst_64 : f32 to vector<16x1xf32>
    %181 = arith.divf %179, %180 : vector<16x1xf32>
    %182 = vector.broadcast %181 : vector<16x1xf32> to vector<16x32xf32>
    %183 = arith.subf %177, %182 : vector<16x32xf32>
    %184 = arith.mulf %183, %183 : vector<16x32xf32>
    %cst_65 = arith.constant dense<0.000000e+00> : vector<16xf32>
    %185 = vector.multi_reduction <add>, %184, %cst_65 [1] : vector<16x32xf32> to vector<16xf32>
    %186 = vector.shape_cast %185 : vector<16xf32> to vector<16x1xf32>
    %cst_66 = arith.constant 3.200000e+01 : f32
    %187 = vector.broadcast %cst_66 : f32 to vector<16x1xf32>
    %188 = arith.divf %186, %187 : vector<16x1xf32>
    %189 = vector.broadcast %181 : vector<16x1xf32> to vector<16x32xf32>
    %190 = arith.subf %177, %189 : vector<16x32xf32>
    %cst_67 = arith.constant 9.99999996E-13 : f32
    %191 = vector.broadcast %cst_67 : f32 to vector<16x1xf32>
    %192 = arith.addf %188, %191 : vector<16x1xf32>
    %193 = math.rsqrt %192 : vector<16x1xf32>
    %194 = vector.broadcast %193 : vector<16x1xf32> to vector<16x32xf32>
    %195 = arith.mulf %190, %194 : vector<16x32xf32>
    %196 = vector.broadcast %34 : vector<1x32xf32> to vector<16x32xf32>
    %197 = arith.mulf %195, %196 : vector<16x32xf32>
    %198 = vector.broadcast %35 : vector<1x32xf32> to vector<16x32xf32>
    %199 = arith.addf %197, %198 : vector<16x32xf32>
    %c1 = arith.constant 1 : index
    %c0_68 = arith.constant 0 : index
    %c0_69 = arith.constant 0 : index
    %200 = vector.load %arg6[%c1, %c0_68, %c0_69] : memref<2x8x128xf32, #tpu.memory_space<vmem>>, vector<1x8x128xf32>
    %201 = vector.shape_cast %200 : vector<1x8x128xf32> to vector<8x128xf32>
    %202 = vector.extract_strided_slice %201 {offsets = [0, 0], sizes = [1, 32], strides = [1, 1]} : vector<8x128xf32> to vector<1x32xf32>
    %203 = vector.extract_strided_slice %201 {offsets = [1, 0], sizes = [1, 32], strides = [1, 1]} : vector<8x128xf32> to vector<1x32xf32>
    %204 = vector.extract_strided_slice %201 {offsets = [2, 0], sizes = [1, 32], strides = [1, 1]} : vector<8x128xf32> to vector<1x32xf32>
    %205 = vector.extract_strided_slice %201 {offsets = [3, 0], sizes = [1, 128], strides = [1, 1]} : vector<8x128xf32> to vector<1x128xf32>
    %206 = vector.extract_strided_slice %201 {offsets = [4, 0], sizes = [1, 128], strides = [1, 1]} : vector<8x128xf32> to vector<1x128xf32>
    %207 = vector.extract_strided_slice %201 {offsets = [5, 0], sizes = [1, 32], strides = [1, 1]} : vector<8x128xf32> to vector<1x32xf32>
    %208 = vector.extract_strided_slice %201 {offsets = [6, 0], sizes = [1, 32], strides = [1, 1]} : vector<8x128xf32> to vector<1x32xf32>
    %c1_70 = arith.constant 1 : index
    %c0_71 = arith.constant 0 : index
    %c0_72 = arith.constant 0 : index
    %209 = vector.load %arg2[%c1_70, %c0_71, %c0_72] : memref<2x32x128xf32, #tpu.memory_space<vmem>>, vector<1x32x128xf32>
    %210 = vector.shape_cast %209 : vector<1x32x128xf32> to vector<32x128xf32>
    %cst_73 = arith.constant dense<0.000000e+00> : vector<16x128xf32>
    %211 = tpu.matmul %199, %210, %cst_73 {dimension_numbers = #tpu.dot_dimension_numbers<[1], [0], [0], [1], [0, 0, 1, 1], [], []>} : vector<16x32xf32>, vector<32x128xf32>, vector<16x128xf32> -> vector<16x128xf32>
    %c1_74 = arith.constant 1 : index
    %c0_75 = arith.constant 0 : index
    %c0_76 = arith.constant 0 : index
    %212 = vector.load %arg3[%c1_74, %c0_75, %c0_76] : memref<2x1x128xf32, #tpu.memory_space<vmem>>, vector<1x1x128xf32>
    %213 = vector.shape_cast %212 : vector<1x1x128xf32> to vector<1x128xf32>
    %214 = vector.broadcast %213 : vector<1x128xf32> to vector<16x128xf32>
    %215 = arith.addf %211, %214 : vector<16x128xf32>
    %216 = vector.extract_strided_slice %215 {offsets = [0, 0], sizes = [16, 8], strides = [1, 1]} : vector<16x128xf32> to vector<16x8xf32>
    %217 = vector.extract_strided_slice %215 {offsets = [0, 32], sizes = [16, 8], strides = [1, 1]} : vector<16x128xf32> to vector<16x8xf32>
    %218 = vector.extract_strided_slice %215 {offsets = [0, 64], sizes = [16, 8], strides = [1, 1]} : vector<16x128xf32> to vector<16x8xf32>
    %219 = tpu.transpose %217, [1, 0] : vector<16x8xf32> -> vector<8x16xf32>
    %cst_77 = arith.constant dense<0.000000e+00> : vector<16x16xf32>
    %220 = tpu.matmul %216, %219, %cst_77 {dimension_numbers = #tpu.dot_dimension_numbers<[1], [0], [0], [1], [0, 0, 1, 1], [], []>} : vector<16x8xf32>, vector<8x16xf32>, vector<16x16xf32> -> vector<16x16xf32>
    %cst_78 = arith.constant 0.353553385 : f32
    %221 = vector.broadcast %cst_78 : f32 to vector<16x16xf32>
    %222 = arith.mulf %220, %221 : vector<16x16xf32>
    %223 = arith.addf %222, %1 : vector<16x16xf32>
    %cst_79 = arith.constant dense<0xFF800000> : vector<16xf32>
    %224 = vector.multi_reduction <maximumf>, %223, %cst_79 [1] : vector<16x16xf32> to vector<16xf32>
    %225 = vector.shape_cast %224 : vector<16xf32> to vector<16x1xf32>
    %226 = vector.broadcast %225 : vector<16x1xf32> to vector<16x16xf32>
    %227 = arith.subf %223, %226 : vector<16x16xf32>
    %228 = math.exp %227 : vector<16x16xf32>
    %cst_80 = arith.constant dense<0.000000e+00> : vector<16xf32>
    %229 = vector.multi_reduction <add>, %228, %cst_80 [1] : vector<16x16xf32> to vector<16xf32>
    %230 = vector.shape_cast %229 : vector<16xf32> to vector<16x1xf32>
    %231 = tpu.reciprocal %230 {approx = true} : vector<16x1xf32> -> vector<16x1xf32>
    %232 = vector.broadcast %231 : vector<16x1xf32> to vector<16x16xf32>
    %233 = arith.mulf %228, %232 : vector<16x16xf32>
    %cst_81 = arith.constant dense<0.000000e+00> : vector<16x8xf32>
    %234 = tpu.matmul %233, %218, %cst_81 {dimension_numbers = #tpu.dot_dimension_numbers<[1], [0], [0], [1], [0, 0, 1, 1], [], []>} : vector<16x16xf32>, vector<16x8xf32>, vector<16x8xf32> -> vector<16x8xf32>
    %235 = vector.extract_strided_slice %215 {offsets = [0, 8], sizes = [16, 8], strides = [1, 1]} : vector<16x128xf32> to vector<16x8xf32>
    %236 = vector.extract_strided_slice %215 {offsets = [0, 40], sizes = [16, 8], strides = [1, 1]} : vector<16x128xf32> to vector<16x8xf32>
    %237 = vector.extract_strided_slice %215 {offsets = [0, 72], sizes = [16, 8], strides = [1, 1]} : vector<16x128xf32> to vector<16x8xf32>
    %238 = tpu.transpose %236, [1, 0] : vector<16x8xf32> -> vector<8x16xf32>
    %cst_82 = arith.constant dense<0.000000e+00> : vector<16x16xf32>
    %239 = tpu.matmul %235, %238, %cst_82 {dimension_numbers = #tpu.dot_dimension_numbers<[1], [0], [0], [1], [0, 0, 1, 1], [], []>} : vector<16x8xf32>, vector<8x16xf32>, vector<16x16xf32> -> vector<16x16xf32>
    %cst_83 = arith.constant 0.353553385 : f32
    %240 = vector.broadcast %cst_83 : f32 to vector<16x16xf32>
    %241 = arith.mulf %239, %240 : vector<16x16xf32>
    %242 = arith.addf %241, %1 : vector<16x16xf32>
    %cst_84 = arith.constant dense<0xFF800000> : vector<16xf32>
    %243 = vector.multi_reduction <maximumf>, %242, %cst_84 [1] : vector<16x16xf32> to vector<16xf32>
    %244 = vector.shape_cast %243 : vector<16xf32> to vector<16x1xf32>
    %245 = vector.broadcast %244 : vector<16x1xf32> to vector<16x16xf32>
    %246 = arith.subf %242, %245 : vector<16x16xf32>
    %247 = math.exp %246 : vector<16x16xf32>
    %cst_85 = arith.constant dense<0.000000e+00> : vector<16xf32>
    %248 = vector.multi_reduction <add>, %247, %cst_85 [1] : vector<16x16xf32> to vector<16xf32>
    %249 = vector.shape_cast %248 : vector<16xf32> to vector<16x1xf32>
    %250 = tpu.reciprocal %249 {approx = true} : vector<16x1xf32> -> vector<16x1xf32>
    %251 = vector.broadcast %250 : vector<16x1xf32> to vector<16x16xf32>
    %252 = arith.mulf %247, %251 : vector<16x16xf32>
    %cst_86 = arith.constant dense<0.000000e+00> : vector<16x8xf32>
    %253 = tpu.matmul %252, %237, %cst_86 {dimension_numbers = #tpu.dot_dimension_numbers<[1], [0], [0], [1], [0, 0, 1, 1], [], []>} : vector<16x16xf32>, vector<16x8xf32>, vector<16x8xf32> -> vector<16x8xf32>
    %254 = vector.extract_strided_slice %215 {offsets = [0, 16], sizes = [16, 8], strides = [1, 1]} : vector<16x128xf32> to vector<16x8xf32>
    %255 = vector.extract_strided_slice %215 {offsets = [0, 48], sizes = [16, 8], strides = [1, 1]} : vector<16x128xf32> to vector<16x8xf32>
    %256 = vector.extract_strided_slice %215 {offsets = [0, 80], sizes = [16, 8], strides = [1, 1]} : vector<16x128xf32> to vector<16x8xf32>
    %257 = tpu.transpose %255, [1, 0] : vector<16x8xf32> -> vector<8x16xf32>
    %cst_87 = arith.constant dense<0.000000e+00> : vector<16x16xf32>
    %258 = tpu.matmul %254, %257, %cst_87 {dimension_numbers = #tpu.dot_dimension_numbers<[1], [0], [0], [1], [0, 0, 1, 1], [], []>} : vector<16x8xf32>, vector<8x16xf32>, vector<16x16xf32> -> vector<16x16xf32>
    %cst_88 = arith.constant 0.353553385 : f32
    %259 = vector.broadcast %cst_88 : f32 to vector<16x16xf32>
    %260 = arith.mulf %258, %259 : vector<16x16xf32>
    %261 = arith.addf %260, %1 : vector<16x16xf32>
    %cst_89 = arith.constant dense<0xFF800000> : vector<16xf32>
    %262 = vector.multi_reduction <maximumf>, %261, %cst_89 [1] : vector<16x16xf32> to vector<16xf32>
    %263 = vector.shape_cast %262 : vector<16xf32> to vector<16x1xf32>
    %264 = vector.broadcast %263 : vector<16x1xf32> to vector<16x16xf32>
    %265 = arith.subf %261, %264 : vector<16x16xf32>
    %266 = math.exp %265 : vector<16x16xf32>
    %cst_90 = arith.constant dense<0.000000e+00> : vector<16xf32>
    %267 = vector.multi_reduction <add>, %266, %cst_90 [1] : vector<16x16xf32> to vector<16xf32>
    %268 = vector.shape_cast %267 : vector<16xf32> to vector<16x1xf32>
    %269 = tpu.reciprocal %268 {approx = true} : vector<16x1xf32> -> vector<16x1xf32>
    %270 = vector.broadcast %269 : vector<16x1xf32> to vector<16x16xf32>
    %271 = arith.mulf %266, %270 : vector<16x16xf32>
    %cst_91 = arith.constant dense<0.000000e+00> : vector<16x8xf32>
    %272 = tpu.matmul %271, %256, %cst_91 {dimension_numbers = #tpu.dot_dimension_numbers<[1], [0], [0], [1], [0, 0, 1, 1], [], []>} : vector<16x16xf32>, vector<16x8xf32>, vector<16x8xf32> -> vector<16x8xf32>
    %273 = vector.extract_strided_slice %215 {offsets = [0, 24], sizes = [16, 8], strides = [1, 1]} : vector<16x128xf32> to vector<16x8xf32>
    %274 = vector.extract_strided_slice %215 {offsets = [0, 56], sizes = [16, 8], strides = [1, 1]} : vector<16x128xf32> to vector<16x8xf32>
    %275 = vector.extract_strided_slice %215 {offsets = [0, 88], sizes = [16, 8], strides = [1, 1]} : vector<16x128xf32> to vector<16x8xf32>
    %276 = tpu.transpose %274, [1, 0] : vector<16x8xf32> -> vector<8x16xf32>
    %cst_92 = arith.constant dense<0.000000e+00> : vector<16x16xf32>
    %277 = tpu.matmul %273, %276, %cst_92 {dimension_numbers = #tpu.dot_dimension_numbers<[1], [0], [0], [1], [0, 0, 1, 1], [], []>} : vector<16x8xf32>, vector<8x16xf32>, vector<16x16xf32> -> vector<16x16xf32>
    %cst_93 = arith.constant 0.353553385 : f32
    %278 = vector.broadcast %cst_93 : f32 to vector<16x16xf32>
    %279 = arith.mulf %277, %278 : vector<16x16xf32>
    %280 = arith.addf %279, %1 : vector<16x16xf32>
    %cst_94 = arith.constant dense<0xFF800000> : vector<16xf32>
    %281 = vector.multi_reduction <maximumf>, %280, %cst_94 [1] : vector<16x16xf32> to vector<16xf32>
    %282 = vector.shape_cast %281 : vector<16xf32> to vector<16x1xf32>
    %283 = vector.broadcast %282 : vector<16x1xf32> to vector<16x16xf32>
    %284 = arith.subf %280, %283 : vector<16x16xf32>
    %285 = math.exp %284 : vector<16x16xf32>
    %cst_95 = arith.constant dense<0.000000e+00> : vector<16xf32>
    %286 = vector.multi_reduction <add>, %285, %cst_95 [1] : vector<16x16xf32> to vector<16xf32>
    %287 = vector.shape_cast %286 : vector<16xf32> to vector<16x1xf32>
    %288 = tpu.reciprocal %287 {approx = true} : vector<16x1xf32> -> vector<16x1xf32>
    %289 = vector.broadcast %288 : vector<16x1xf32> to vector<16x16xf32>
    %290 = arith.mulf %285, %289 : vector<16x16xf32>
    %cst_96 = arith.constant dense<0.000000e+00> : vector<16x8xf32>
    %291 = tpu.matmul %290, %275, %cst_96 {dimension_numbers = #tpu.dot_dimension_numbers<[1], [0], [0], [1], [0, 0, 1, 1], [], []>} : vector<16x16xf32>, vector<16x8xf32>, vector<16x8xf32> -> vector<16x8xf32>
    %292 = tpu.concatenate %234, %253, %272, %291 in 1 : vector<16x8xf32>, vector<16x8xf32>, vector<16x8xf32>, vector<16x8xf32> -> vector<16x32xf32>
    %293 = vector.extract_strided_slice %210 {offsets = [0, 96], sizes = [32, 32], strides = [1, 1]} : vector<32x128xf32> to vector<32x32xf32>
    %cst_97 = arith.constant dense<0.000000e+00> : vector<16x32xf32>
    %294 = tpu.matmul %292, %293, %cst_97 {dimension_numbers = #tpu.dot_dimension_numbers<[1], [0], [0], [1], [0, 0, 1, 1], [], []>} : vector<16x32xf32>, vector<32x32xf32>, vector<16x32xf32> -> vector<16x32xf32>
    %295 = vector.broadcast %202 : vector<1x32xf32> to vector<16x32xf32>
    %296 = arith.addf %294, %295 : vector<16x32xf32>
    %297 = arith.addf %296, %199 : vector<16x32xf32>
    %cst_98 = arith.constant dense<0.000000e+00> : vector<16xf32>
    %298 = vector.multi_reduction <add>, %297, %cst_98 [1] : vector<16x32xf32> to vector<16xf32>
    %299 = vector.shape_cast %298 : vector<16xf32> to vector<16x1xf32>
    %cst_99 = arith.constant 3.200000e+01 : f32
    %300 = vector.broadcast %cst_99 : f32 to vector<16x1xf32>
    %301 = arith.divf %299, %300 : vector<16x1xf32>
    %302 = vector.broadcast %301 : vector<16x1xf32> to vector<16x32xf32>
    %303 = arith.subf %297, %302 : vector<16x32xf32>
    %304 = arith.mulf %303, %303 : vector<16x32xf32>
    %cst_100 = arith.constant dense<0.000000e+00> : vector<16xf32>
    %305 = vector.multi_reduction <add>, %304, %cst_100 [1] : vector<16x32xf32> to vector<16xf32>
    %306 = vector.shape_cast %305 : vector<16xf32> to vector<16x1xf32>
    %cst_101 = arith.constant 3.200000e+01 : f32
    %307 = vector.broadcast %cst_101 : f32 to vector<16x1xf32>
    %308 = arith.divf %306, %307 : vector<16x1xf32>
    %309 = vector.broadcast %301 : vector<16x1xf32> to vector<16x32xf32>
    %310 = arith.subf %297, %309 : vector<16x32xf32>
    %cst_102 = arith.constant 9.99999996E-13 : f32
    %311 = vector.broadcast %cst_102 : f32 to vector<16x1xf32>
    %312 = arith.addf %308, %311 : vector<16x1xf32>
    %313 = math.rsqrt %312 : vector<16x1xf32>
    %314 = vector.broadcast %313 : vector<16x1xf32> to vector<16x32xf32>
    %315 = arith.mulf %310, %314 : vector<16x32xf32>
    %316 = vector.broadcast %203 : vector<1x32xf32> to vector<16x32xf32>
    %317 = arith.mulf %315, %316 : vector<16x32xf32>
    %318 = vector.broadcast %204 : vector<1x32xf32> to vector<16x32xf32>
    %319 = arith.addf %317, %318 : vector<16x32xf32>
    %c1_103 = arith.constant 1 : index
    %c0_104 = arith.constant 0 : index
    %c0_105 = arith.constant 0 : index
    %320 = vector.load %arg4[%c1_103, %c0_104, %c0_105] : memref<2x32x128xf32, #tpu.memory_space<vmem>>, vector<1x32x128xf32>
    %321 = vector.shape_cast %320 : vector<1x32x128xf32> to vector<32x128xf32>
    %cst_106 = arith.constant dense<0.000000e+00> : vector<16x128xf32>
    %322 = tpu.matmul %319, %321, %cst_106 {dimension_numbers = #tpu.dot_dimension_numbers<[1], [0], [0], [1], [0, 0, 1, 1], [], []>} : vector<16x32xf32>, vector<32x128xf32>, vector<16x128xf32> -> vector<16x128xf32>
    %323 = vector.broadcast %205 : vector<1x128xf32> to vector<16x128xf32>
    %324 = arith.addf %322, %323 : vector<16x128xf32>
    %325 = arith.mulf %324, %324 : vector<16x128xf32>
    %326 = arith.mulf %324, %325 : vector<16x128xf32>
    %cst_107 = arith.constant 4.471500e-02 : f32
    %327 = vector.broadcast %cst_107 : f32 to vector<16x128xf32>
    %328 = arith.mulf %327, %326 : vector<16x128xf32>
    %329 = arith.addf %324, %328 : vector<16x128xf32>
    %cst_108 = arith.constant 0.797884583 : f32
    %330 = vector.broadcast %cst_108 : f32 to vector<16x128xf32>
    %331 = arith.mulf %330, %329 : vector<16x128xf32>
    %332 = math.tanh %331 : vector<16x128xf32>
    %cst_109 = arith.constant 1.000000e+00 : f32
    %333 = vector.broadcast %cst_109 : f32 to vector<16x128xf32>
    %334 = arith.addf %333, %332 : vector<16x128xf32>
    %cst_110 = arith.constant 5.000000e-01 : f32
    %335 = vector.broadcast %cst_110 : f32 to vector<16x128xf32>
    %336 = arith.mulf %335, %334 : vector<16x128xf32>
    %337 = arith.mulf %324, %336 : vector<16x128xf32>
    %c1_111 = arith.constant 1 : index
    %c0_112 = arith.constant 0 : index
    %c0_113 = arith.constant 0 : index
    %338 = vector.load %arg5[%c1_111, %c0_112, %c0_113] : memref<2x128x128xf32, #tpu.memory_space<vmem>>, vector<1x128x128xf32>
    %339 = vector.shape_cast %338 : vector<1x128x128xf32> to vector<128x128xf32>
    %cst_114 = arith.constant dense<0.000000e+00> : vector<16x128xf32>
    %340 = tpu.matmul %337, %339, %cst_114 {dimension_numbers = #tpu.dot_dimension_numbers<[1], [0], [0], [1], [0, 0, 1, 1], [], []>} : vector<16x128xf32>, vector<128x128xf32>, vector<16x128xf32> -> vector<16x128xf32>
    %341 = vector.broadcast %206 : vector<1x128xf32> to vector<16x128xf32>
    %342 = arith.addf %340, %341 : vector<16x128xf32>
    %c1_115 = arith.constant 1 : index
    %c0_116 = arith.constant 0 : index
    %c0_117 = arith.constant 0 : index
    %343 = vector.load %arg10[%c1_115, %c0_116, %c0_117] : memref<2x16x128xf32, #tpu.memory_space<vmem>>, vector<1x16x128xf32>
    %344 = vector.shape_cast %343 : vector<1x16x128xf32> to vector<16x128xf32>
    %345 = vector.shape_cast %337 : vector<16x128xf32> to vector<1x16x128xf32>
    tpu.vector_store %arg10[%c1_115, %c0_116, %c0_117], %345 {strides = array<i32>} : memref<2x16x128xf32, #tpu.memory_space<vmem>>, vector<1x16x128xf32>,
    %c1_118 = arith.constant 1 : index
    %c0_119 = arith.constant 0 : index
    %c0_120 = arith.constant 0 : index
    %346 = vector.load %arg11[%c1_118, %c0_119, %c0_120] : memref<2x16x128xf32, #tpu.memory_space<vmem>>, vector<1x16x128xf32>
    %347 = vector.shape_cast %346 : vector<1x16x128xf32> to vector<16x128xf32>
    %348 = vector.shape_cast %342 : vector<16x128xf32> to vector<1x16x128xf32>
    tpu.vector_store %arg11[%c1_118, %c0_119, %c0_120], %348 {strides = array<i32>} : memref<2x16x128xf32, #tpu.memory_space<vmem>>, vector<1x16x128xf32>,
    %349 = vector.extract_strided_slice %342 {offsets = [0, 0], sizes = [16, 32], strides = [1, 1]} : vector<16x128xf32> to vector<16x32xf32>
    %350 = arith.addf %349, %319 : vector<16x32xf32>
    %cst_121 = arith.constant dense<0.000000e+00> : vector<16xf32>
    %351 = vector.multi_reduction <add>, %350, %cst_121 [1] : vector<16x32xf32> to vector<16xf32>
    %352 = vector.shape_cast %351 : vector<16xf32> to vector<16x1xf32>
    %cst_122 = arith.constant 3.200000e+01 : f32
    %353 = vector.broadcast %cst_122 : f32 to vector<16x1xf32>
    %354 = arith.divf %352, %353 : vector<16x1xf32>
    %355 = vector.broadcast %354 : vector<16x1xf32> to vector<16x32xf32>
    %356 = arith.subf %350, %355 : vector<16x32xf32>
    %357 = arith.mulf %356, %356 : vector<16x32xf32>
    %cst_123 = arith.constant dense<0.000000e+00> : vector<16xf32>
    %358 = vector.multi_reduction <add>, %357, %cst_123 [1] : vector<16x32xf32> to vector<16xf32>
    %359 = vector.shape_cast %358 : vector<16xf32> to vector<16x1xf32>
    %cst_124 = arith.constant 3.200000e+01 : f32
    %360 = vector.broadcast %cst_124 : f32 to vector<16x1xf32>
    %361 = arith.divf %359, %360 : vector<16x1xf32>
    %362 = vector.broadcast %354 : vector<16x1xf32> to vector<16x32xf32>
    %363 = arith.subf %350, %362 : vector<16x32xf32>
    %cst_125 = arith.constant 9.99999996E-13 : f32
    %364 = vector.broadcast %cst_125 : f32 to vector<16x1xf32>
    %365 = arith.addf %361, %364 : vector<16x1xf32>
    %366 = math.rsqrt %365 : vector<16x1xf32>
    %367 = vector.broadcast %366 : vector<16x1xf32> to vector<16x32xf32>
    %368 = arith.mulf %363, %367 : vector<16x32xf32>
    %369 = vector.broadcast %207 : vector<1x32xf32> to vector<16x32xf32>
    %370 = arith.mulf %368, %369 : vector<16x32xf32>
    %371 = vector.broadcast %208 : vector<1x32xf32> to vector<16x32xf32>
    %372 = arith.addf %370, %371 : vector<16x32xf32>
    %c0_126 = arith.constant 0 : index
    %c0_127 = arith.constant 0 : index
    %373 = vector.load %arg7[%c0_126, %c0_127] : memref<64x128xf32, #tpu.memory_space<vmem>>, vector<64x128xf32>
    %374 = vector.extract_strided_slice %373 {offsets = [0, 0], sizes = [32, 32], strides = [1, 1]} : vector<64x128xf32> to vector<32x32xf32>
    %375 = vector.extract_strided_slice %373 {offsets = [32, 0], sizes = [32, 128], strides = [1, 1]} : vector<64x128xf32> to vector<32x128xf32>
    %cst_128 = arith.constant dense<0.000000e+00> : vector<16x32xf32>
    %376 = tpu.matmul %372, %374, %cst_128 {dimension_numbers = #tpu.dot_dimension_numbers<[1], [0], [0], [1], [0, 0, 1, 1], [], []>} : vector<16x32xf32>, vector<32x32xf32>, vector<16x32xf32> -> vector<16x32xf32>
    %377 = vector.extract_strided_slice %0 {offsets = [2, 0], sizes = [1, 32], strides = [1, 1]} : vector<8x128xf32> to vector<1x32xf32>
    %378 = vector.broadcast %377 : vector<1x32xf32> to vector<16x32xf32>
    %379 = arith.addf %376, %378 : vector<16x32xf32>
    %380 = arith.mulf %379, %379 : vector<16x32xf32>
    %381 = arith.mulf %379, %380 : vector<16x32xf32>
    %cst_129 = arith.constant 4.471500e-02 : f32
    %382 = vector.broadcast %cst_129 : f32 to vector<16x32xf32>
    %383 = arith.mulf %382, %381 : vector<16x32xf32>
    %384 = arith.addf %379, %383 : vector<16x32xf32>
    %cst_130 = arith.constant 0.797884583 : f32
    %385 = vector.broadcast %cst_130 : f32 to vector<16x32xf32>
    %386 = arith.mulf %385, %384 : vector<16x32xf32>
    %387 = math.tanh %386 : vector<16x32xf32>
    %cst_131 = arith.constant 1.000000e+00 : f32
    %388 = vector.broadcast %cst_131 : f32 to vector<16x32xf32>
    %389 = arith.addf %388, %387 : vector<16x32xf32>
    %cst_132 = arith.constant 5.000000e-01 : f32
    %390 = vector.broadcast %cst_132 : f32 to vector<16x32xf32>
    %391 = arith.mulf %390, %389 : vector<16x32xf32>
    %392 = arith.mulf %379, %391 : vector<16x32xf32>
    %393 = vector.extract_strided_slice %0 {offsets = [3, 0], sizes = [1, 32], strides = [1, 1]} : vector<8x128xf32> to vector<1x32xf32>
    %394 = vector.extract_strided_slice %0 {offsets = [4, 0], sizes = [1, 32], strides = [1, 1]} : vector<8x128xf32> to vector<1x32xf32>
    %cst_133 = arith.constant dense<0.000000e+00> : vector<16xf32>
    %395 = vector.multi_reduction <add>, %392, %cst_133 [1] : vector<16x32xf32> to vector<16xf32>
    %396 = vector.shape_cast %395 : vector<16xf32> to vector<16x1xf32>
    %cst_134 = arith.constant 3.200000e+01 : f32
    %397 = vector.broadcast %cst_134 : f32 to vector<16x1xf32>
    %398 = arith.divf %396, %397 : vector<16x1xf32>
    %399 = vector.broadcast %398 : vector<16x1xf32> to vector<16x32xf32>
    %400 = arith.subf %392, %399 : vector<16x32xf32>
    %401 = arith.mulf %400, %400 : vector<16x32xf32>
    %cst_135 = arith.constant dense<0.000000e+00> : vector<16xf32>
    %402 = vector.multi_reduction <add>, %401, %cst_135 [1] : vector<16x32xf32> to vector<16xf32>
    %403 = vector.shape_cast %402 : vector<16xf32> to vector<16x1xf32>
    %cst_136 = arith.constant 3.200000e+01 : f32
    %404 = vector.broadcast %cst_136 : f32 to vector<16x1xf32>
    %405 = arith.divf %403, %404 : vector<16x1xf32>
    %406 = vector.broadcast %398 : vector<16x1xf32> to vector<16x32xf32>
    %407 = arith.subf %392, %406 : vector<16x32xf32>
    %cst_137 = arith.constant 9.99999996E-13 : f32
    %408 = vector.broadcast %cst_137 : f32 to vector<16x1xf32>
    %409 = arith.addf %405, %408 : vector<16x1xf32>
    %410 = math.rsqrt %409 : vector<16x1xf32>
    %411 = vector.broadcast %410 : vector<16x1xf32> to vector<16x32xf32>
    %412 = arith.mulf %407, %411 : vector<16x32xf32>
    %413 = vector.broadcast %393 : vector<1x32xf32> to vector<16x32xf32>
    %414 = arith.mulf %412, %413 : vector<16x32xf32>
    %415 = vector.broadcast %394 : vector<1x32xf32> to vector<16x32xf32>
    %416 = arith.addf %414, %415 : vector<16x32xf32>
    %cst_138 = arith.constant dense<0.000000e+00> : vector<16x128xf32>
    %417 = tpu.matmul %416, %375, %cst_138 {dimension_numbers = #tpu.dot_dimension_numbers<[1], [0], [0], [1], [0, 0, 1, 1], [], []>} : vector<16x32xf32>, vector<32x128xf32>, vector<16x128xf32> -> vector<16x128xf32>
    %418 = vector.extract_strided_slice %0 {offsets = [5, 0], sizes = [1, 128], strides = [1, 1]} : vector<8x128xf32> to vector<1x128xf32>
    %419 = vector.broadcast %418 : vector<1x128xf32> to vector<16x128xf32>
    %420 = arith.addf %417, %419 : vector<16x128xf32>
    %c0_139 = arith.constant 0 : index
    %c0_140 = arith.constant 0 : index
    %421 = vector.load %arg9[%c0_139, %c0_140] : memref<16x128xf32, #tpu.memory_space<vmem>>, vector<16x128xf32>
    tpu.vector_store %arg9[%c0_139, %c0_140], %420 {strides = array<i32>} : memref<16x128xf32, #tpu.memory_space<vmem>>, vector<16x128xf32>,
    return
  }
}

</mosaic_0001>

<bundles_post_ra>
// kernel: bert_forward.1
= control target key start
LH: loop header
LB: loop body
LE: loop exit
PB: predicated region body
PF: predicated region fallthrough
CT: control target
= control target key end

     0   :  { %vm40_vm0 = vcmask 261120   ;;  %v68_v23 = vlaneseq  ;;  %vm179_vm1 = vcmask 64512   ;;  %s3618_s13 = smov 96   ;;  %s3619_s14 = smov 120   ;;  %vm267_vm2 = vcmask 130048   ;;  %s4376_s0 = inlined_call_operand.vmem [shape: f32[16,32], index: 0, kind: input, shape index: {}]   ;;  %s4377_s2 = inlined_call_operand.vmem [shape: f32[2,32,128], index: 2, kind: input, shape index: {}]   ;;  %s4378_s8 = inlined_call_operand.vmem [shape: f32[8,128], index: 8, kind: input, shape index: {}]   ;;  %s4379_s3 = inlined_call_operand.vmem [shape: f32[2,1,128], index: 3, kind: input, shape index: {}]   ;;  %s4380_s1 = inlined_call_operand.vmem [shape: f32[16,16], index: 1, kind: input, shape index: {}]   ;;  %s4381_s6 = inlined_call_operand.vmem [shape: f32[2,8,128], index: 6, kind: input, shape index: {}]   ;;  %s4382_s4 = inlined_call_operand.vmem [shape: f32[2,32,128], index: 4, kind: input, shape index: {}]   ;;  %s4383_s5 = inlined_call_operand.vmem [shape: f32[2,128,128], index: 5, kind: input, shape index: {}]   ;;  %s4384_s10 = inlined_call_operand.vmem [shape: f32[2,16,128], index: 10, kind: output, shape index: {1}]   ;;  %s4385_s11 = inlined_call_operand.vmem [shape: f32[2,16,128], index: 11, kind: output, shape index: {2}]   ;;  %s4386_s7 = inlined_call_operand.vmem [shape: f32[64,128], index: 7, kind: input, shape index: {}]   ;;  %s4387_s9 = inlined_call_operand.vmem [shape: f32[16,128], index: 9, kind: output, shape index: {0}]  }
   0x1   :  { %v38_v0 = vld [vmem:[%s4376_s0] sm:$0xff]  ;;  %v39_v1 = vld [vmem:[%s4376_s0 + $0x8] sm:$0xff]  ;;  %v3706_v14 = vld [vmem:[%s4377_s2 + $0x18] sm:$0xff]  ;;  %s3620_s15 = smov 88   ;;  %s3621_s20 = smov 64   ;;  %vm1017_vm3 = vcmask 195584  }
   0x2   :  { %v41_v2 = vsel %vm40_vm0, %v38_v0, 0.0  ;;  %v44_v3 = vsel %vm40_vm0, %v39_v1, 0.0  ;;  %v3711_v15 = vld [vmem:[%s4377_s2 + $0x10] sm:$0xff]  ;;  %3230 = vmatprep.subr.mxu1 %v3706_v14  ;;  %v3718_v16 = vld [vmem:[%s4377_s2 + $0x8] sm:$0xff]  ;;  %v3727_v17 = vld [vmem:[%s4377_s2] sm:$0xff]  ;;  %v3731_v25 = vshrl.u32 %v68_v23, 7 }
   0x3   :  { %42 = vadd.xlane.f32.xlu0 %v41_v2  ;;  %3231 = vmatpush3.msra.mxu1 %v3706_v14  ;;  %v35_v27 = vld [vmem:[%s4378_s8] sm:$0xff]  ;;  %v3788_v51 = vld [vmem:[%s4380_s1 + $0x8] sm:$0xff]  ;;  %s3622_s0 = smov 56   ;;  %s3623_s21 = smov 80  }
   0x4   :  { %3232 = vmatprep.subr.mxu1 %v3711_v15  ;;  %v3734_v26 = vsub.s32 0, %v3731_v25  ;;  %v3740_v28 = vsub.s32 1, %v3731_v25  ;;  %v2986_v39 = vld [vmem:[%s4379_s3] ss:$0 sm:$0xff]  ;;  %s3624_s22 = smov 112   ;;  %s3625_s23 = smov 48  }
   0x5   :  { %3233 = vmatpush3.msra.mxu1 %v3711_v15  ;;  %v3793_v54 = vld [vmem:[%s4380_s1] sm:$0xff]  ;;  %s3626_s24 = smov 72   ;;  %s3627_s25 = smov 104  }
   0x6   :  { %3234 = vmatprep.subr.mxu1 %v3718_v16  ;;  %v71_v29 = vrot.slane %v35_v27, %v3734_v26  ;;  %v77_v32 = vrot.slane %v35_v27, %v3740_v28  ;;  %s3628_s26 = smov 40   ;;  %s3629_s27 = smov 32  }
   0x7   :  { %45 = vadd.xlane.f32.xlu0 %v44_v3  ;;  %3235 = vmatpush3.msra.mxu1 %v3718_v16  ;;  %s4392_s28 = smov 16   ;;  %s4390_s29 = smov 8  }
   0x8   :  { %3236 = vmatprep.subr.mxu1 %v3727_v17  ;;  %s4388_s30 = smov 24  }
   0x9   :  { %3237 = vmatpush3.msra.mxu1 %v3727_v17 }
  0x8c   :  { %v43_v4 = vpop.xlane.xlu0 %42 }
  0x8d   :  { %v48_v5 = vmul.f32 0.03125, %v43_v4 }
  0x8f   :  { %v50_v6 = vsub.f32 %v38_v0, %v48_v5 }
  0x90   :  { %v46_v7 = vpop.xlane.xlu0 %45 }
  0x91   :  { %v49_v8 = vmul.f32 0.03125, %v46_v7  ;;  %v52_v9 = vmul.f32 %v50_v6, %v50_v6 }
  0x93   :  { %v51_v10 = vsub.f32 %v39_v1, %v49_v8  ;;  %v54_v11 = vsel %vm40_vm0, %v52_v9, 0.0 }
  0x94   :  { %55 = vadd.xlane.f32.xlu1 %v54_v11 }
  0x95   :  { %v53_v12 = vmul.f32 %v51_v10, %v51_v10 }
  0x97   :  { %v57_v13 = vsel %vm40_vm0, %v53_v12, 0.0 }
  0x98   :  { %58 = vadd.xlane.f32.xlu1 %v57_v13 }
 0x11d   :  { %v56_v18 = vpop.xlane.xlu1 %55 }
 0x11e   :  { %v60_v19 = vmul.f32 0.03125, %v56_v18 }
 0x120   :  { %v62_v20 = vadd.f32 1e-12, %v60_v19 }
 0x121   :  { %v59_v21 = vpop.xlane.xlu1 %58 }
 0x122   :  { %3515 = vrsqrt.f32 %v62_v20  ;;  %v61_v22 = vmul.f32 0.03125, %v59_v21 }
 0x124   :  { %v63_v24 = vadd.f32 1e-12, %v61_v22 }
 0x126   :  { %3517 = vrsqrt.f32 %v63_v24 }
 0x12f   :  { %v3516_v30 = vpop.eup %3515 }
 0x130   :  { %v66_v31 = vmul.f32 %v3516_v30, %v50_v6 }
 0x132   :  { %v72_v33 = vmul.f32 %v71_v29, %v66_v31 }
 0x133   :  { %v3518_v34 = vpop.eup %3517 }
 0x134   :  { %v67_v35 = vmul.f32 %v3518_v34, %v51_v10  ;;  %v3744_v36 = vadd.f32 %v77_v32, %v72_v33 }
 0x136   :  { %v73_v37 = vmul.f32 %v71_v29, %v67_v35  ;;  %3238 = vmatprep.mubr.msk.f32.mxu1 %vm40_vm0, %v3744_v36 }
 0x138   :  { %v3748_v38 = vadd.f32 %v77_v32, %v73_v37 }
 0x13a   :  { %3239 = vmatmul.mubr.msk.f32.vlgmr.msra.gmra.mxu1 %vm40_vm0, %v3748_v38 }
 0x1fa   :  { %v3240_v40 = vpop.f32.mrf.mxu1 }
 0x1fb   :  { %v3755_v41 = vadd.f32 %v3240_v40, %v2986_v39 }
 0x1fc   :  { %v164_v42 = vpop.f32.mrf.mxu1 }
 0x1fd   :  { %v3757_v43 = vadd.f32 %v2986_v39, %v164_v42  ;;  %177 = vrot.lane.b32.xlu0 %v3755_v41, %s3618_s13 }
 0x1ff   :  { %175 = vrot.lane.b32.xlu1 %v3757_v43, %s3618_s13  ;;  %3245 = vmatprep.mubr.msk.f32.mxu1 %vm179_vm1, %v3757_v43 }
 0x201   :  { %377 = vrot.lane.b32.xlu0 %v3757_v43, %s3619_s14 }
 0x203   :  { %383 = vrot.lane.b32.xlu1 %v3755_v41, %s3620_s15 }
 0x207   :  { %381 = vrot.lane.b32.xlu1 %v3757_v43, %s3620_s15 }
 0x20b   :  { %379 = vrot.lane.b32.xlu1 %v3755_v41, %s3619_s14 }
 0x26f   :  { %v178_v44 = vpop.permute.xlu0 %177 }
 0x270   :  { %3241 = vmatprep.subr.msk.mxu1 %vm179_vm1, %v178_v44 }
 0x271   :  { %3242 = vmatpush3.xpose.msk.msra.mxu1 %vm179_vm1, %v178_v44  ;;  %v176_v45 = vpop.permute.xlu1 %175 }
 0x272   :  { %3243 = vmatprep.subr.msk.mxu1 %vm179_vm1, %v176_v45 }
 0x273   :  { %v378_v47 = vpop.permute.xlu0 %377 }
 0x275   :  { %3244 = vmatpush3.xpose.msk.msra.mxu1 %vm179_vm1, %v176_v45  ;;  %v384_v46 = vpop.permute.xlu1 %383 }
 0x276   :  { %3255 = vmatprep.subr.msk.mxu1 %vm179_vm1, %v384_v46 }
 0x278   :  { %3246 = vmatmul.mubr.msk.f32.vlgmr.msra.gmra.mxu1 %vm179_vm1, %v3755_v41 }
 0x279   :  { %v382_v48 = vpop.permute.xlu1 %381  ;;  %3256 = vmatpush3.xpose.msk.msra.mxu1 %vm179_vm1, %v384_v46  ;;  %3259 = vmatprep.mubr.msk.f32.mxu1 %vm179_vm1, %v378_v47 }
 0x27a   :  { %3257 = vmatprep.subr.msk.mxu1 %vm179_vm1, %v382_v48 }
 0x27d   :  { %3258 = vmatpush3.xpose.msk.msra.mxu1 %vm179_vm1, %v382_v48  ;;  %v380_v49 = vpop.permute.xlu1 %379 }
 0x280   :  { %3260 = vmatmul.mubr.msk.f32.vlgmr.msra.gmra.mxu1 %vm179_vm1, %v380_v49 }
 0x338   :  { %v3247_v50 = vpop.f32.mrf.mxu1 }
 0x339   :  { %v264_v52 = vmul.f32 0.35355338, %v3247_v50 }
 0x33a   :  { %v254_v53 = vpop.f32.mrf.mxu1 }
 0x33b   :  { %v263_v55 = vmul.f32 0.35355338, %v254_v53  ;;  %v266_v56 = vadd.f32 %v264_v52, %v3788_v51 }
 0x33d   :  { %v271_v57 = vsel %vm267_vm2, %v266_v56, -inf  ;;  %v265_v58 = vadd.f32 %v263_v55, %v3793_v54 }
 0x33e   :  { %272 = vmax.xlane.f32.xlu1 %v271_v57 }
 0x33f   :  { %v268_v59 = vsel %vm267_vm2, %v265_v58, -inf }
 0x340   :  { %v3261_v60 = vpop.f32.mrf.mxu1  ;;  %269 = vmax.xlane.f32.xlu0 %v268_v59 }
 0x341   :  { %v469_v62 = vmul.f32 0.35355338, %v3261_v60 }
 0x342   :  { %v459_v61 = vpop.f32.mrf.mxu1 }
 0x343   :  { %v468_v63 = vmul.f32 0.35355338, %v459_v61  ;;  %v471_v2 = vadd.f32 %v469_v62, %v3788_v51 }
 0x345   :  { %v470_v0 = vadd.f32 %v468_v63, %v3793_v54  ;;  %v475_v3 = vsel %vm267_vm2, %v471_v2, -inf }
 0x347   :  { %v472_v1 = vsel %vm267_vm2, %v470_v0, -inf }
 0x348   :  { %473 = vmax.xlane.f32.xlu0 %v472_v1 }
 0x34c   :  { %476 = vmax.xlane.f32.xlu0 %v475_v3 }
 0x34f   :  { %290 = vrot.lane.b32.xlu1 %v3757_v43, %s3621_s20 }
 0x353   :  { %496 = vrot.lane.b32.xlu1 %v3755_v41, %s3622_s0 }
 0x357   :  { %494 = vrot.lane.b32.xlu1 %v3757_v43, %s3622_s0 }
 0x362   :  { %292 = vrot.lane.b32.xlu0 %v3755_v41, %s3621_s20 }
 0x3c7   :  { %v273_v4 = vpop.xlane.xlu1 %272 }
 0x3c8   :  { %v275_v5 = vsub.f32 %v266_v56, %v273_v4 }
 0x3c9   :  { %v270_v6 = vpop.xlane.xlu0 %269 }
 0x3ca   :  { %v278_v7 = vmul.f32 1.442695, %v275_v5  ;;  %v274_v8 = vsub.f32 %v265_v58, %v270_v6 }
 0x3cb   :  { %v291_v19 = vpop.permute.xlu1 %290 }
 0x3cc   :  { %3519 = vpow2.f32 %v278_v7  ;;  %v276_v9 = vmul.f32 1.442695, %v274_v8 }
 0x3ce   :  { %3521 = vpow2.f32 %v276_v9 }
 0x3cf   :  { %v497_v29 = vpop.permute.xlu1 %496 }
 0x3d1   :  { %v474_v10 = vpop.xlane.xlu0 %473 }
 0x3d2   :  { %v478_v11 = vsub.f32 %v470_v0, %v474_v10 }
 0x3d3   :  { %v495_v34 = vpop.permute.xlu1 %494 }
 0x3d4   :  { %v480_v12 = vmul.f32 1.442695, %v478_v11 }
 0x3d5   :  { %v477_v13 = vpop.xlane.xlu0 %476 }
 0x3d6   :  { %3523 = vpow2.f32 %v480_v12  ;;  %v479_v18 = vsub.f32 %v471_v2, %v477_v13 }
 0x3d8   :  { %v482_v20 = vmul.f32 1.442695, %v479_v18 }
 0x3d9   :  { %v3520_v21 = vpop.eup %3519  ;;  %v293_v22 = vpop.permute.xlu0 %292 }
 0x3da   :  { %3525 = vpow2.f32 %v482_v20  ;;  %3248 = vmatprep.subr.mxu0 %v293_v22  ;;  %v283_v23 = vsel %vm267_vm2, %v3520_v21, 0.0 }
 0x3db   :  { %v3522_v24 = vpop.eup %3521  ;;  %284 = vadd.xlane.f32.xlu1 %v283_v23  ;;  %3249 = vmatpush3.msra.mxu0 %v293_v22 }
 0x3dc   :  { %3250 = vmatprep.subr.mxu0 %v291_v19  ;;  %v280_v27 = vsel %vm267_vm2, %v3522_v24, 0.0 }
 0x3dd   :  { %281 = vadd.xlane.f32.xlu0 %v280_v27  ;;  %3251 = vmatpush3.msra.mxu0 %v291_v19 }
 0x3de   :  { %3262 = vmatprep.subr.mxu0 %v497_v29 }
 0x3e3   :  { %v3524_v30 = vpop.eup %3523 }
 0x3e4   :  { %v484_v31 = vsel %vm267_vm2, %v3524_v30, 0.0 }
 0x3e5   :  { %485 = vadd.xlane.f32.xlu0 %v484_v31 }
 0x3e7   :  { %v3526_v32 = vpop.eup %3525 }
 0x3e8   :  { %v487_v33 = vsel %vm267_vm2, %v3526_v32, 0.0 }
 0x3e9   :  { %488 = vadd.xlane.f32.xlu1 %v487_v33 }
 0x3fa   :  { %585 = vrot.lane.b32.xlu1 %v3757_v43, %s3623_s21 }
 0x3fb   :  { %587 = vrot.lane.b32.xlu0 %v3755_v41, %s3623_s21 }
 0x3fe   :  { %583 = vrot.lane.b32.xlu1 %v3755_v41, %s3624_s22 }
 0x3ff   :  { %581 = vrot.lane.b32.xlu0 %v3757_v43, %s3624_s22 }
 0x464   :  { %v285_v35 = vpop.xlane.xlu1 %284 }
 0x465   :  { %3527 = vrcp.f32 %v285_v35 }
 0x466   :  { %v282_v37 = vpop.xlane.xlu0 %281 }
 0x467   :  { %3529 = vrcp.f32 %v282_v37 }
 0x46e   :  { %v486_v39 = vpop.xlane.xlu0 %485 }
 0x46f   :  { %3531 = vrcp.f32 %v486_v39 }
 0x472   :  { %v489_v40 = vpop.xlane.xlu1 %488  ;;  %v3528_v42 = vpop.eup %3527 }
 0x473   :  { %3533 = vrcp.f32 %v489_v40  ;;  %v289_v46 = vmul.f32 %v3528_v42, %v3520_v21  ;;  %v588_v47 = vpop.permute.xlu0 %587 }
 0x474   :  { %v3530_v44 = vpop.eup %3529 }
 0x475   :  { %v288_v45 = vmul.f32 %v3530_v44, %v3522_v24 }
 0x476   :  { %v586_v55 = vpop.permute.xlu1 %585 }
 0x477   :  { %3252 = vmatprep.mubr.msk.f32.mxu0 %vm267_vm2, %v288_v45  ;;  %v582_v53 = vpop.permute.xlu0 %581 }
 0x478   :  { %3253 = vmatmul.mubr.msk.f32.vlgmr.msra.gmra.mxu0 %vm267_vm2, %v289_v46 }
 0x479   :  { %3263 = vmatpush3.msra.mxu0 %v497_v29 }
 0x47a   :  { %3264 = vmatprep.subr.mxu0 %v495_v34  ;;  %v584_v56 = vpop.permute.xlu1 %583 }
 0x47b   :  { %3265 = vmatpush3.msra.mxu0 %v495_v34 }
 0x47c   :  { %v3532_v48 = vpop.eup %3531  ;;  %3269 = vmatprep.subr.msk.mxu0 %vm179_vm1, %v588_v47 }
 0x47d   :  { %v492_v49 = vmul.f32 %v3532_v48, %v3524_v30 }
 0x47f   :  { %3266 = vmatprep.mubr.msk.f32.mxu0 %vm267_vm2, %v492_v49 }
 0x480   :  { %v3534_v50 = vpop.eup %3533 }
 0x481   :  { %v493_v52 = vmul.f32 %v3534_v50, %v3526_v32 }
 0x483   :  { %3267 = vmatmul.mubr.msk.f32.vlgmr.msra.gmra.mxu0 %vm267_vm2, %v493_v52 }
 0x484   :  { %3270 = vmatpush3.xpose.msk.msra.mxu0 %vm179_vm1, %v588_v47  ;;  %3273 = vmatprep.mubr.msk.f32.mxu0 %vm179_vm1, %v582_v53 }
 0x485   :  { %3271 = vmatprep.subr.msk.mxu0 %vm179_vm1, %v586_v55 }
 0x488   :  { %3272 = vmatpush3.xpose.msk.msra.mxu0 %vm179_vm1, %v586_v55 }
 0x48b   :  { %3274 = vmatmul.mubr.msk.f32.vlgmr.msra.gmra.mxu0 %vm179_vm1, %v584_v56 }
 0x538   :  { %v3833_v57 = vpop.f32.mrf.mxu0 }
 0x53a   :  { %v3835_v58 = vpop.f32.mrf.mxu0 }
 0x543   :  { %v3837_v59 = vpop.f32.mrf.mxu0 }
 0x545   :  { %v3839_v60 = vpop.f32.mrf.mxu0 }
 0x54b   :  { %v3275_v61 = vpop.f32.mrf.mxu0 }
 0x54c   :  { %v673_v62 = vmul.f32 0.35355338, %v3275_v61 }
 0x54d   :  { %v663_v63 = vpop.f32.mrf.mxu0 }
 0x54e   :  { %v672_v0 = vmul.f32 0.35355338, %v663_v63  ;;  %v675_v1 = vadd.f32 %v673_v62, %v3788_v51 }
 0x550   :  { %v679_v2 = vsel %vm267_vm2, %v675_v1, -inf  ;;  %v674_v3 = vadd.f32 %v672_v0, %v3793_v54 }
 0x551   :  { %680 = vmax.xlane.f32.xlu1 %v679_v2 }
 0x552   :  { %v676_v4 = vsel %vm267_vm2, %v674_v3, -inf }
 0x553   :  { %677 = vmax.xlane.f32.xlu0 %v676_v4 }
 0x562   :  { %698 = vrot.lane.b32.xlu1 %v3757_v43, %s3625_s23 }
 0x566   :  { %791 = vrot.lane.b32.xlu1 %v3755_v41, %s3626_s24 }
 0x56a   :  { %789 = vrot.lane.b32.xlu1 %v3757_v43, %s3626_s24 }
 0x56e   :  { %787 = vrot.lane.b32.xlu1 %v3755_v41, %s3627_s25 }
 0x5da   :  { %v681_v5 = vpop.xlane.xlu1 %680 }
 0x5db   :  { %v683_v6 = vsub.f32 %v675_v1, %v681_v5 }
 0x5dc   :  { %v678_v7 = vpop.xlane.xlu0 %677 }
 0x5dd   :  { %v686_v8 = vmul.f32 1.442695, %v683_v6  ;;  %v682_v9 = vsub.f32 %v674_v3, %v678_v7 }
 0x5de   :  { %v699_v21 = vpop.permute.xlu1 %698 }
 0x5df   :  { %3535 = vpow2.f32 %v686_v8  ;;  %v684_v10 = vmul.f32 1.442695, %v682_v9 }
 0x5e1   :  { %3537 = vpow2.f32 %v684_v10 }
 0x5e2   :  { %v792_v23 = vpop.permute.xlu1 %791 }
 0x5e6   :  { %v790_v32 = vpop.permute.xlu1 %789 }
 0x5ea   :  { %v788_v33 = vpop.permute.xlu1 %787 }
 0x5ec   :  { %v3536_v11 = vpop.eup %3535 }
 0x5ed   :  { %v691_v12 = vsel %vm267_vm2, %v3536_v11, 0.0 }
 0x5ee   :  { %v3538_v13 = vpop.eup %3537  ;;  %692 = vadd.xlane.f32.xlu0 %v691_v12 }
 0x5ef   :  { %v688_v18 = vsel %vm267_vm2, %v3538_v13, 0.0 }
 0x5f2   :  { %689 = vadd.xlane.f32.xlu0 %v688_v18 }
 0x608   :  { %700 = vrot.lane.b32.xlu0 %v3755_v41, %s3625_s23 }
 0x60c   :  { %785 = vrot.lane.b32.xlu0 %v3757_v43, %s3627_s25 }
 0x677   :  { %v693_v19 = vpop.xlane.xlu0 %692 }
 0x678   :  { %3539 = vrcp.f32 %v693_v19 }
 0x67b   :  { %v690_v20 = vpop.xlane.xlu0 %689 }
 0x67c   :  { %3541 = vrcp.f32 %v690_v20 }
 0x67f   :  { %v701_v22 = vpop.permute.xlu0 %700 }
 0x680   :  { %3276 = vmatprep.subr.mxu1 %v701_v22 }
 0x681   :  { %3277 = vmatpush3.msra.mxu1 %v701_v22 }
 0x682   :  { %3278 = vmatprep.subr.mxu1 %v699_v21 }
 0x683   :  { %3279 = vmatpush3.msra.mxu1 %v699_v21  ;;  %v786_v31 = vpop.permute.xlu0 %785 }
 0x684   :  { %3283 = vmatprep.subr.msk.mxu1 %vm179_vm1, %v792_v23 }
 0x685   :  { %v3540_v24 = vpop.eup %3539 }
 0x686   :  { %v697_v30 = vmul.f32 %v3540_v24, %v3536_v11 }
 0x689   :  { %v3542_v27 = vpop.eup %3541 }
 0x68a   :  { %v696_v29 = vmul.f32 %v3542_v27, %v3538_v13 }
 0x68c   :  { %3280 = vmatprep.mubr.msk.f32.mxu1 %vm267_vm2, %v696_v29 }
 0x68d   :  { %3281 = vmatmul.mubr.msk.f32.vlgmr.msra.gmra.mxu1 %vm267_vm2, %v697_v30 }
 0x68e   :  { %3284 = vmatpush3.xpose.msk.msra.mxu1 %vm179_vm1, %v792_v23  ;;  %3287 = vmatprep.mubr.msk.f32.mxu1 %vm179_vm1, %v786_v31 }
 0x68f   :  { %3285 = vmatprep.subr.msk.mxu1 %vm179_vm1, %v790_v32 }
 0x692   :  { %3286 = vmatpush3.xpose.msk.msra.mxu1 %vm179_vm1, %v790_v32 }
 0x695   :  { %3288 = vmatmul.mubr.msk.f32.vlgmr.msra.gmra.mxu1 %vm179_vm1, %v788_v33 }
 0x74d   :  { %v3282_v34 = vpop.f32.mrf.mxu1 }
 0x74f   :  { %v776_v35 = vpop.f32.mrf.mxu1 }
 0x755   :  { %v3289_v37 = vpop.f32.mrf.mxu1 }
 0x756   :  { %v877_v39 = vmul.f32 0.35355338, %v3289_v37 }
 0x757   :  { %v867_v40 = vpop.f32.mrf.mxu1 }
 0x758   :  { %v876_v42 = vmul.f32 0.35355338, %v867_v40  ;;  %v879_v44 = vadd.f32 %v877_v39, %v3788_v51 }
 0x75a   :  { %v883_v45 = vsel %vm267_vm2, %v879_v44, -inf  ;;  %v878_v46 = vadd.f32 %v876_v42, %v3793_v54 }
 0x75b   :  { %884 = vmax.xlane.f32.xlu1 %v883_v45 }
 0x75c   :  { %v880_v47 = vsel %vm267_vm2, %v878_v46, -inf }
 0x75d   :  { %881 = vmax.xlane.f32.xlu0 %v880_v47  ;;  %v1162_v47 = vld [vmem:[%s4382_s4 + $0x8] sm:$0xff] }
 0x76c   :  { %902 = vrot.lane.b32.xlu1 %v3757_v43, %s3628_s26 }
 0x770   :  { %1034 = vrot.lane.b32.xlu1 %v3706_v14, %s3629_s27 }
 0x774   :  { %1032 = vrot.lane.b32.xlu1 %v3711_v15, %s3629_s27 }
 0x778   :  { %1030 = vrot.lane.b32.xlu1 %v3718_v16, %s3629_s27 }
 0x77c   :  { %999 = vrot.lane.b32.xlu1 %v776_v35, %s4392_s28 }
 0x7e4   :  { %v885_v48 = vpop.xlane.xlu1 %884 }
 0x7e5   :  { %v887_v49 = vsub.f32 %v879_v44, %v885_v48  ;;  %v1161_v48 = vld [vmem:[%s4382_s4] sm:$0xff] }
 0x7e6   :  { %v882_v50 = vpop.xlane.xlu0 %881 }
 0x7e7   :  { %v890_v52 = vmul.f32 1.442695, %v887_v49  ;;  %v886_v53 = vsub.f32 %v878_v46, %v882_v50  ;;  %v1163_v46 = vld [vmem:[%s4382_s4 + $0x10] sm:$0xff] }
 0x7e8   :  { %v903_v62 = vpop.permute.xlu1 %902 }
 0x7e9   :  { %3543 = vpow2.f32 %v890_v52  ;;  %v888_v43 = vmul.f32 1.442695, %v886_v53 }
 0x7eb   :  { %3545 = vpow2.f32 %v888_v43 }
 0x7f6   :  { %v3544_v55 = vpop.eup %3543 }
 0x7f7   :  { %v895_v14 = vsel %vm267_vm2, %v3544_v55, 0.0 }
 0x7f8   :  { %v3546_v56 = vpop.eup %3545  ;;  %896 = vadd.xlane.f32.xlu0 %v895_v14  ;;  %v3931_v14 = vsub.s32 2, %v3731_v25 }
 0x7f9   :  { %v892_v15 = vsel %vm267_vm2, %v3546_v56, 0.0 }
 0x7fc   :  { %893 = vadd.xlane.f32.xlu0 %v892_v15 }
 0x812   :  { %904 = vrot.lane.b32.xlu0 %v3755_v41, %s3628_s26  ;;  %v1035_v41 = vpop.permute.xlu1 %1034 }
 0x816   :  { %991 = vrot.lane.b32.xlu0 %v3839_v60, %s4390_s29 }
 0x81a   :  { %993 = vrot.lane.b32.xlu0 %v3837_v59, %s4390_s29  ;;  %v1033_v59 = vpop.permute.xlu1 %1032 }
 0x81e   :  { %1001 = vrot.lane.b32.xlu0 %v3282_v34, %s4392_s28 }
 0x822   :  { %1028 = vrot.lane.b32.xlu0 %v3727_v17, %s3629_s27  ;;  %v1031_v17 = vpop.permute.xlu1 %1030 }
 0x826   :  { %v1000_v9 = vpop.permute.xlu1 %999 }
 0x881   :  { %v897_v16 = vpop.xlane.xlu0 %896 }
 0x882   :  { %3547 = vrcp.f32 %v897_v16 }
 0x885   :  { %v894_v61 = vpop.xlane.xlu0 %893 }
 0x886   :  { %3549 = vrcp.f32 %v894_v61 }
 0x889   :  { %v905_v63 = vpop.permute.xlu0 %904 }
 0x88a   :  { %3290 = vmatprep.subr.mxu0 %v905_v63 }
 0x88b   :  { %3291 = vmatpush3.msra.mxu0 %v905_v63 }
 0x88c   :  { %3292 = vmatprep.subr.mxu0 %v903_v62 }
 0x88d   :  { %3293 = vmatpush3.msra.mxu0 %v903_v62  ;;  %v992_v3 = vpop.permute.xlu0 %991 }
 0x88e   :  { %3297 = vmatprep.subr.mxu0 %v1035_v41  ;;  %v1013_v10 = vsel %vm179_vm1, %v3835_v58, %v992_v3  ;;  %v3908_v58 = vld [vmem:[%s4381_s6] sm:$0xff] }
 0x88f   :  { %v3548_v60 = vpop.eup %3547  ;;  %v1015_v12 = vsel %vm267_vm2, %v1013_v10, %v1000_v9  ;;  %v1023_v22 = vrot.slane %v3908_v58, %v3734_v26  ;;  %v1158_v61 = vrot.slane %v3908_v58, %v3931_v14  ;;  %v1280_v3 = vld [vmem:[%s4383_s5 + $0x60] sm:$0xff]  ;;  %v1274_v9 = vld [vmem:[%s4383_s5 + $0x30] sm:$0xff]  ;;  %v1273_v10 = vld [vmem:[%s4383_s5 + $0x28] sm:$0xff] }
 0x890   :  { %v901_v2 = vmul.f32 %v3548_v60, %v3544_v55 }
 0x891   :  { %v994_v4 = vpop.permute.xlu0 %993 }
 0x892   :  { %v1014_v18 = vsel %vm179_vm1, %v3833_v57, %v994_v4  ;;  %v1279_v4 = vld [vmem:[%s4383_s5 + $0x58] sm:$0xff] }
 0x893   :  { %v3550_v0 = vpop.eup %3549 }
 0x894   :  { %v900_v1 = vmul.f32 %v3550_v0, %v3546_v56  ;;  %v1152_v56 = vrot.slane %v3908_v58, %v3740_v28 }
 0x895   :  { %v1002_v5 = vpop.permute.xlu0 %1001 }
 0x896   :  { %3294 = vmatprep.mubr.msk.f32.mxu0 %vm267_vm2, %v900_v1  ;;  %v1016_v19 = vsel %vm267_vm2, %v1014_v18, %v1002_v5  ;;  %v1283_v1 = vld [vmem:[%s4383_s5 + $0x78] sm:$0xff]  ;;  %v1278_v5 = vld [vmem:[%s4383_s5 + $0x50] sm:$0xff]  ;;  %v1269_v18 = vld [vmem:[%s4383_s5 + $0x8] sm:$0xff] }
 0x897   :  { %3295 = vmatmul.mubr.msk.f32.vlgmr.msra.gmra.mxu0 %vm267_vm2, %v901_v2  ;;  %v1282_v2 = vld [vmem:[%s4383_s5 + $0x70] sm:$0xff] }
 0x898   :  { %3298 = vmatpush3.msra.mxu0 %v1035_v41 }
 0x899   :  { %3299 = vmatprep.subr.mxu0 %v1033_v59  ;;  %v1029_v6 = vpop.permute.xlu0 %1028 }
 0x89a   :  { %3300 = vmatpush3.msra.mxu0 %v1033_v59 }
 0x89b   :  { %3301 = vmatprep.subr.mxu0 %v1031_v17 }
 0x89c   :  { %3302 = vmatpush3.msra.mxu0 %v1031_v17  ;;  %v1281_v17 = vld [vmem:[%s4383_s5 + $0x68] sm:$0xff] }
 0x89d   :  { %3303 = vmatprep.subr.mxu0 %v1029_v6 }
 0x89e   :  { %3304 = vmatpush3.msra.mxu0 %v1029_v6  ;;  %v1277_v6 = vld [vmem:[%s4383_s5 + $0x48] sm:$0xff] }
 0x89f   :  { %3319 = vmatprep.subr.mxu0 %v1283_v1 }
 0x957   :  { %v3296_v7 = vpop.f32.mrf.mxu0 }
 0x959   :  { %v980_v8 = vpop.f32.mrf.mxu0 }
 0x95a   :  { %1007 = vrot.lane.b32.xlu1 %v980_v8, %s4388_s30  ;;  %v1275_v8 = vld [vmem:[%s4383_s5 + $0x38] sm:$0xff] }
 0x95e   :  { %1009 = vrot.lane.b32.xlu1 %v3296_v7, %s4388_s30  ;;  %v1276_v7 = vld [vmem:[%s4383_s5 + $0x40] sm:$0xff] }
 0x9cc   :  { %v1008_v11 = vpop.permute.xlu1 %1007 }
 0x9cd   :  { %v1018_v13 = vsel %vm1017_vm3, %v1015_v12, %v1008_v11  ;;  %v1272_v11 = vld [vmem:[%s4383_s5 + $0x20] sm:$0xff]  ;;  %v1271_v12 = vld [vmem:[%s4383_s5 + $0x18] sm:$0xff] }
 0x9ce   :  { %3305 = vmatprep.mubr.msk.f32.mxu0 %vm40_vm0, %v1018_v13  ;;  %v1270_v13 = vld [vmem:[%s4383_s5 + $0x10] sm:$0xff] }
 0x9d0   :  { %v1010_v20 = vpop.permute.xlu1 %1009 }
 0x9d1   :  { %v1019_v21 = vsel %vm1017_vm3, %v1016_v19, %v1010_v20  ;;  %v1268_v19 = vld [vmem:[%s4383_s5] sm:$0xff]  ;;  %v3994_v20 = vsub.s32 3, %v3731_v25 }
 0x9d2   :  { %3306 = vmatmul.mubr.msk.f32.vlgmr.msra.gmra.mxu0 %vm40_vm0, %v1019_v21 }
 0x9d3   :  { %3320 = vmatpush3.msra.mxu0 %v1283_v1  ;;  %v1168_v21 = vrot.slane %v3908_v58, %v3994_v20 }
 0x9d4   :  { %3321 = vmatprep.subr.mxu0 %v1282_v2 }
 0x9d5   :  { %3322 = vmatpush3.msra.mxu0 %v1282_v2 }
 0x9d6   :  { %3323 = vmatprep.subr.mxu0 %v1281_v17 }
 0x9d7   :  { %3324 = vmatpush3.msra.mxu0 %v1281_v17 }
 0x9d8   :  { %3325 = vmatprep.subr.mxu0 %v1280_v3 }
 0x9d9   :  { %3326 = vmatpush3.msra.mxu0 %v1280_v3 }
 0x9da   :  { %3327 = vmatprep.subr.mxu0 %v1279_v4 }
 0x9db   :  { %3328 = vmatpush3.msra.mxu0 %v1279_v4  ;;  %v4029_v4 = vld [vmem:[%s4377_s2 + $0x30] sm:$0xff] }
 0x9dc   :  { %3329 = vmatprep.subr.mxu0 %v1278_v5 }
 0x9dd   :  { %3330 = vmatpush3.msra.mxu0 %v1278_v5  ;;  %v4036_v5 = vld [vmem:[%s4377_s2 + $0x28] sm:$0xff] }
 0x9de   :  { %3331 = vmatprep.subr.mxu0 %v1277_v6 }
 0x9df   :  { %3332 = vmatpush3.msra.mxu0 %v1277_v6  ;;  %v4043_v6 = vld [vmem:[%s4377_s2 + $0x20] sm:$0xff] }
 0x9e0   :  { %3333 = vmatprep.subr.mxu0 %v1276_v7 }
 0x9e1   :  { %3334 = vmatpush3.msra.mxu0 %v1276_v7 }
 0x9e2   :  { %3335 = vmatprep.subr.mxu0 %v1275_v8 }
 0x9e3   :  { %3336 = vmatpush3.msra.mxu0 %v1275_v8 }
 0x9e4   :  { %3337 = vmatprep.subr.mxu0 %v1274_v9 }
 0x9e5   :  { %3338 = vmatpush3.msra.mxu0 %v1274_v9 }
 0x9e6   :  { %3339 = vmatprep.subr.mxu0 %v1273_v10 }
 0x9e7   :  { %3340 = vmatpush3.msra.mxu0 %v1273_v10 }
 0x9e8   :  { %3341 = vmatprep.subr.mxu0 %v1272_v11 }
 0x9e9   :  { %3342 = vmatpush3.msra.mxu0 %v1272_v11 }
 0x9ea   :  { %3343 = vmatprep.subr.mxu0 %v1271_v12 }
 0x9eb   :  { %3344 = vmatpush3.msra.mxu0 %v1271_v12 }
 0x9ec   :  { %3345 = vmatprep.subr.mxu0 %v1270_v13 }
 0x9ed   :  { %3346 = vmatpush3.msra.mxu0 %v1270_v13  ;;  %v4050_v13 = vsub.s32 5, %v3731_v25 }
 0x9ee   :  { %3347 = vmatprep.subr.mxu0 %v1269_v18 }
 0x9ef   :  { %3348 = vmatpush3.msra.mxu0 %v1269_v18 }
 0x9f0   :  { %3349 = vmatprep.subr.mxu0 %v1268_v19 }
 0x9f1   :  { %3350 = vmatpush3.msra.mxu0 %v1268_v19  ;;  %v1398_v19 = vrot.slane %v3908_v58, %v4050_v13 }
 0xa92   :  { %v3307_v23 = vpop.f32.mrf.mxu0 }
 0xa93   :  { %v1118_v24 = vadd.f32 %v3307_v23, %v1023_v22 }
 0xa94   :  { %v1112_v27 = vpop.f32.mrf.mxu0 }
 0xa95   :  { %v1113_v29 = vadd.f32 %v1112_v27, %v1023_v22  ;;  %v1122_v57 = vadd.f32 %v1118_v24, %v3748_v38 }
 0xa97   :  { %v1126_v30 = vsel %vm40_vm0, %v1122_v57, 0.0  ;;  %v1121_v31 = vadd.f32 %v1113_v29, %v3744_v36  ;;  %v1164_v36 = vld [vmem:[%s4382_s4 + $0x18] sm:$0xff] }
 0xa98   :  { %1127 = vadd.xlane.f32.xlu1 %v1126_v30  ;;  %3308 = vmatprep.subr.mxu1 %v1164_v36 }
 0xa99   :  { %v1123_v32 = vsel %vm40_vm0, %v1121_v31, 0.0  ;;  %3309 = vmatpush3.msra.mxu1 %v1164_v36 }
 0xa9a   :  { %1124 = vadd.xlane.f32.xlu0 %v1123_v32  ;;  %3310 = vmatprep.subr.mxu1 %v1163_v46 }
 0xa9b   :  { %3311 = vmatpush3.msra.mxu1 %v1163_v46 }
 0xa9c   :  { %3312 = vmatprep.subr.mxu1 %v1162_v47 }
 0xa9d   :  { %3313 = vmatpush3.msra.mxu1 %v1162_v47 }
 0xa9e   :  { %3314 = vmatprep.subr.mxu1 %v1161_v48 }
 0xa9f   :  { %3315 = vmatpush3.msra.mxu1 %v1161_v48  ;;  %v4005_v48 = vsub.s32 4, %v3731_v25 }
 0xb21   :  { %v1128_v33 = vpop.xlane.xlu1 %1127 }
 0xb22   :  { %v1130_v34 = vmul.f32 0.03125, %v1128_v33 }
 0xb23   :  { %v1125_v35 = vpop.xlane.xlu0 %1124 }
 0xb24   :  { %v1129_v37 = vmul.f32 0.03125, %v1125_v35  ;;  %v1132_v39 = vsub.f32 %v1122_v57, %v1130_v34 }
 0xb26   :  { %v1131_v40 = vsub.f32 %v1121_v31, %v1129_v37  ;;  %v1134_v45 = vmul.f32 %v1132_v39, %v1132_v39 }
 0xb28   :  { %v1133_v42 = vmul.f32 %v1131_v40, %v1131_v40  ;;  %v1138_v38 = vsel %vm40_vm0, %v1134_v45, 0.0 }
 0xb2a   :  { %v1135_v44 = vsel %vm40_vm0, %v1133_v42, 0.0 }
 0xb2b   :  { %1136 = vadd.xlane.f32.xlu0 %v1135_v44 }
 0xb2f   :  { %1139 = vadd.xlane.f32.xlu0 %v1138_v38 }
 0xbb4   :  { %v1137_v49 = vpop.xlane.xlu0 %1136 }
 0xbb5   :  { %v1141_v50 = vmul.f32 0.03125, %v1137_v49  ;;  %v1287_v49 = vrot.slane %v3908_v58, %v4005_v48 }
 0xbb7   :  { %v1143_v52 = vadd.f32 1e-12, %v1141_v50 }
 0xbb8   :  { %v1140_v53 = vpop.xlane.xlu0 %1139 }
 0xbb9   :  { %3551 = vrsqrt.f32 %v1143_v52  ;;  %v1142_v43 = vmul.f32 0.03125, %v1140_v53 }
 0xbbb   :  { %v1144_v55 = vadd.f32 1e-12, %v1142_v43 }
 0xbbd   :  { %3553 = vrsqrt.f32 %v1144_v55 }
 0xbc6   :  { %v3552_v15 = vpop.eup %3551 }
 0xbc7   :  { %v1147_v16 = vmul.f32 %v3552_v15, %v1131_v40 }
 0xbc9   :  { %v1153_v62 = vmul.f32 %v1152_v56, %v1147_v16 }
 0xbca   :  { %v3554_v63 = vpop.eup %3553 }
 0xbcb   :  { %v1148_v41 = vmul.f32 %v3554_v63, %v1132_v39  ;;  %v3937_v60 = vadd.f32 %v1158_v61, %v1153_v62 }
 0xbcd   :  { %v1154_v0 = vmul.f32 %v1152_v56, %v1148_v41  ;;  %3316 = vmatprep.mubr.msk.f32.mxu1 %vm40_vm0, %v3937_v60 }
 0xbcf   :  { %v3941_v59 = vadd.f32 %v1158_v61, %v1154_v0 }
 0xbd1   :  { %3317 = vmatmul.mubr.msk.f32.vlgmr.msra.gmra.mxu1 %vm40_vm0, %v3941_v59 }
 0xc91   :  { %v3318_v22 = vpop.f32.mrf.mxu1 }
 0xc92   :  { %v1247_v23 = vadd.f32 %v3318_v22, %v1168_v21 }
 0xc93   :  { %v1241_v24 = vpop.f32.mrf.mxu1 }
 0xc94   :  { %v1251_v27 = vmul.f32 %v1247_v23, %v1247_v23  ;;  %v1242_v29 = vadd.f32 %v1241_v24, %v1168_v21  ;;  %v1403_v21 = vsub.s32 6, %v3731_v25 }
 0xc96   :  { %v1253_v57 = vmul.f32 %v1251_v27, %v1247_v23  ;;  %v1250_v30 = vmul.f32 %v1242_v29, %v1242_v29 }
 0xc98   :  { %v1255_v31 = vmul.f32 0.044715, %v1253_v57  ;;  %v1252_v32 = vmul.f32 %v1250_v30, %v1242_v29 }
 0xc9a   :  { %v1257_v33 = vadd.f32 %v1255_v31, %v1247_v23  ;;  %v1254_v34 = vmul.f32 0.044715, %v1252_v32  ;;  %v3023_v32 = vld [vmem:[%s4379_s3 + $0x1] ss:$0 sm:$0xff] }
 0xc9c   :  { %v1259_v35 = vmul.f32 0.7978846, %v1257_v33  ;;  %v1256_v37 = vadd.f32 %v1254_v34, %v1242_v29 }
 0xc9e   :  { %3555 = vtanh.f32 %v1259_v35  ;;  %v1258_v39 = vmul.f32 0.7978846, %v1256_v37 }
 0xca0   :  { %3557 = vtanh.f32 %v1258_v39 }
 0xcab   :  { %v3556_v40 = vpop.eup %3555 }
 0xcac   :  { %v1263_v42 = vadd.f32 1.0, %v3556_v40 }
 0xcad   :  { %v3558_v44 = vpop.eup %3557 }
 0xcae   :  { %v1262_v45 = vadd.f32 1.0, %v3558_v44  ;;  %v1265_v38 = vmul.f32 0.5, %v1263_v42 }
 0xcb0   :  { %v1264_v36 = vmul.f32 0.5, %v1262_v45  ;;  %v1267_v46 = vmul.f32 %v1265_v38, %v1247_v23 }
 0xcb2   :  { %v1266_v47 = vmul.f32 %v1264_v36, %v1242_v29  ;;  %1364 = vst [vmem:[%s4384_s10 + $0x8] sm:$0xff] %v1267_v46  ;;  %v1404_v29 = vrot.slane %v3908_v58, %v1403_v21 }
 0xcb4   :  { %3351 = vmatprep.mubr.f32.mxu0 %v1266_v47  ;;  %1363 = vst [vmem:[%s4384_s10] sm:$0xff] %v1266_v47 }
 0xcb5   :  { %3352 = vmatmul.mubr.f32.vlgmr.msra.gmra.mxu0 %v1267_v46 }
 0xd75   :  { %v3353_v50 = vpop.f32.mrf.mxu0 }
 0xd76   :  { %v1360_v52 = vadd.f32 %v3353_v50, %v1287_v49 }
 0xd77   :  { %v1354_v53 = vpop.f32.mrf.mxu0 }
 0xd78   :  { %1366 = vst [vmem:[%s4385_s11 + $0x8] sm:$0xff] %v1360_v52  ;;  %v1355_v43 = vadd.f32 %v1354_v53, %v1287_v49  ;;  %v1368_v55 = vadd.f32 %v1360_v52, %v3941_v59 }
 0xd7a   :  { %1365 = vst [vmem:[%s4385_s11] sm:$0xff] %v1355_v43  ;;  %v1372_v56 = vsel %vm40_vm0, %v1368_v55, 0.0  ;;  %v1367_v15 = vadd.f32 %v1355_v43, %v3937_v60  ;;  %v4024_v60 = vld [vmem:[%s4377_s2 + $0x38] sm:$0xff] }
 0xd7b   :  { %1373 = vadd.xlane.f32.xlu1 %v1372_v56  ;;  %3354 = vmatprep.subr.mxu1 %v4024_v60 }
 0xd7c   :  { %v1369_v16 = vsel %vm40_vm0, %v1367_v15, 0.0  ;;  %3355 = vmatpush3.msra.mxu1 %v4024_v60 }
 0xd7d   :  { %1370 = vadd.xlane.f32.xlu0 %v1369_v16  ;;  %3356 = vmatprep.subr.mxu1 %v4029_v4 }
 0xd7e   :  { %3357 = vmatpush3.msra.mxu1 %v4029_v4 }
 0xd7f   :  { %3358 = vmatprep.subr.mxu1 %v4036_v5 }
 0xd80   :  { %3359 = vmatpush3.msra.mxu1 %v4036_v5 }
 0xd81   :  { %3360 = vmatprep.subr.mxu1 %v4043_v6 }
 0xd82   :  { %3361 = vmatpush3.msra.mxu1 %v4043_v6 }
 0xe04   :  { %v1374_v61 = vpop.xlane.xlu1 %1373 }
 0xe05   :  { %v1376_v62 = vmul.f32 0.03125, %v1374_v61 }
 0xe06   :  { %v1371_v63 = vpop.xlane.xlu0 %1370 }
 0xe07   :  { %v1378_v41 = vsub.f32 %v1368_v55, %v1376_v62  ;;  %v1375_v0 = vmul.f32 0.03125, %v1371_v63 }
 0xe09   :  { %v1377_v1 = vsub.f32 %v1367_v15, %v1375_v0  ;;  %v1380_v2 = vmul.f32 %v1378_v41, %v1378_v41 }
 0xe0b   :  { %v1384_v59 = vsel %vm40_vm0, %v1380_v2, 0.0  ;;  %v1379_v17 = vmul.f32 %v1377_v1, %v1377_v1 }
 0xe0c   :  { %1385 = vadd.xlane.f32.xlu1 %v1384_v59 }
 0xe0d   :  { %v1381_v3 = vsel %vm40_vm0, %v1379_v17, 0.0 }
 0xe0e   :  { %1382 = vadd.xlane.f32.xlu0 %v1381_v3 }
 0xe95   :  { %v1386_v7 = vpop.xlane.xlu1 %1385 }
 0xe96   :  { %v1388_v8 = vmul.f32 0.03125, %v1386_v7 }
 0xe97   :  { %v1383_v9 = vpop.xlane.xlu0 %1382 }
 0xe98   :  { %v1390_v10 = vadd.f32 1e-12, %v1388_v8  ;;  %v1387_v11 = vmul.f32 0.03125, %v1383_v9 }
 0xe9a   :  { %3559 = vrsqrt.f32 %v1390_v10  ;;  %v1389_v12 = vadd.f32 1e-12, %v1387_v11 }
 0xe9c   :  { %3561 = vrsqrt.f32 %v1389_v12 }
 0xea7   :  { %v3560_v18 = vpop.eup %3559 }
 0xea8   :  { %v1394_v22 = vmul.f32 %v3560_v18, %v1378_v41 }
 0xea9   :  { %v3562_v23 = vpop.eup %3561 }
 0xeaa   :  { %v1393_v24 = vmul.f32 %v3562_v23, %v1377_v1  ;;  %v1400_v27 = vmul.f32 %v1398_v19, %v1394_v22 }
 0xeac   :  { %v1399_v57 = vmul.f32 %v1398_v19, %v1393_v24  ;;  %v4060_v31 = vadd.f32 %v1404_v29, %v1400_v27 }
 0xeae   :  { %v4058_v30 = vadd.f32 %v1404_v29, %v1399_v57 }
 0xeb0   :  { %3362 = vmatprep.mubr.msk.f32.mxu1 %vm40_vm0, %v4058_v30 }
 0xeb1   :  { %3363 = vmatmul.mubr.msk.f32.vlgmr.msra.gmra.mxu1 %vm40_vm0, %v4060_v31 }
 0xf71   :  { %v3364_v33 = vpop.f32.mrf.mxu1 }
 0xf72   :  { %v4069_v34 = vadd.f32 %v3364_v33, %v3023_v32 }
 0xf73   :  { %v1494_v35 = vpop.f32.mrf.mxu1 }
 0xf74   :  { %v4071_v58 = vadd.f32 %v3023_v32, %v1494_v35  ;;  %1507 = vrot.lane.b32.xlu0 %v4069_v34, %s3618_s13  ;;  %v4132_v32 = vld [vmem:[%s4380_s1 + $0x8] sm:$0xff] }
 0xf76   :  { %1505 = vrot.lane.b32.xlu1 %v4071_v58, %s3618_s13  ;;  %3369 = vmatprep.mubr.msk.f32.mxu1 %vm179_vm1, %v4071_v58 }
 0xfe6   :  { %v1508_v37 = vpop.permute.xlu0 %1507 }
 0xfe7   :  { %3365 = vmatprep.subr.msk.mxu1 %vm179_vm1, %v1508_v37 }
 0xfe8   :  { %3366 = vmatpush3.xpose.msk.msra.mxu1 %vm179_vm1, %v1508_v37  ;;  %v1506_v39 = vpop.permute.xlu1 %1505  ;;  %v4139_v37 = vld [vmem:[%s4380_s1] sm:$0xff]  ;;  %s4394_s1 = smov 16  }
 0xfe9   :  { %3367 = vmatprep.subr.msk.mxu1 %vm179_vm1, %v1506_v39 }
 0xfec   :  { %3368 = vmatpush3.xpose.msk.msra.mxu1 %vm179_vm1, %v1506_v39 }
 0xfef   :  { %3370 = vmatmul.mubr.msk.f32.vlgmr.msra.gmra.mxu1 %vm179_vm1, %v4069_v34 }
0x10af   :  { %v3371_v40 = vpop.f32.mrf.mxu1 }
0x10b0   :  { %v1593_v42 = vmul.f32 0.35355338, %v3371_v40 }
0x10b1   :  { %v1583_v44 = vpop.f32.mrf.mxu1 }
0x10b2   :  { %v1592_v45 = vmul.f32 0.35355338, %v1583_v44  ;;  %v1595_v38 = vadd.f32 %v1593_v42, %v3788_v51 }
0x10b4   :  { %v1599_v36 = vsel %vm267_vm2, %v1595_v38, -inf  ;;  %v1594_v46 = vadd.f32 %v1592_v45, %v3793_v54 }
0x10b5   :  { %1600 = vmax.xlane.f32.xlu0 %v1599_v36 }
0x10b6   :  { %v1596_v47 = vsel %vm267_vm2, %v1594_v46, -inf }
0x10b7   :  { %1597 = vmax.xlane.f32.xlu1 %v1596_v47 }
0x10c8   :  { %1618 = vrot.lane.b32.xlu1 %v4071_v58, %s3621_s20 }
0x10cb   :  { %1620 = vrot.lane.b32.xlu0 %v4069_v34, %s3621_s20  ;;  %s4395_s20 = smov 8  }
0x10cc   :  { %1711 = vrot.lane.b32.xlu1 %v4069_v34, %s3620_s15 }
0x10d0   :  { %1709 = vrot.lane.b32.xlu1 %v4071_v58, %s3620_s15 }
0x113e   :  { %v1601_v51 = vpop.xlane.xlu0 %1600 }
0x113f   :  { %v1603_v49 = vsub.f32 %v1595_v38, %v1601_v51 }
0x1140   :  { %v1598_v50 = vpop.xlane.xlu1 %1597 }
0x1141   :  { %v1606_v54 = vmul.f32 1.442695, %v1603_v49  ;;  %v1602_v52 = vsub.f32 %v1594_v46, %v1598_v50 }
0x1142   :  { %v1621_v53 = vpop.permute.xlu0 %1620 }
0x1143   :  { %3563 = vpow2.f32 %v1606_v54  ;;  %v1604_v43 = vmul.f32 1.442695, %v1602_v52  ;;  %3372 = vmatprep.subr.mxu1 %v1621_v53 }
0x1144   :  { %3373 = vmatpush3.msra.mxu1 %v1621_v53  ;;  %v1619_v55 = vpop.permute.xlu1 %1618 }
0x1145   :  { %3565 = vpow2.f32 %v1604_v43  ;;  %3374 = vmatprep.subr.mxu1 %v1619_v55 }
0x1146   :  { %3375 = vmatpush3.msra.mxu1 %v1619_v55 }
0x1148   :  { %v1712_v56 = vpop.permute.xlu1 %1711 }
0x1149   :  { %3379 = vmatprep.subr.msk.mxu1 %vm179_vm1, %v1712_v56 }
0x114c   :  { %v1710_v63 = vpop.permute.xlu1 %1709 }
0x1150   :  { %v3564_v15 = vpop.eup %3563 }
0x1151   :  { %v1611_v16 = vsel %vm267_vm2, %v3564_v15, 0.0 }
0x1152   :  { %v3566_v61 = vpop.eup %3565  ;;  %1612 = vadd.xlane.f32.xlu1 %v1611_v16 }
0x1153   :  { %v1608_v62 = vsel %vm267_vm2, %v3566_v61, 0.0 }
0x1154   :  { %1609 = vadd.xlane.f32.xlu0 %v1608_v62 }
0x1163   :  { %1705 = vrot.lane.b32.xlu1 %v4071_v58, %s3619_s14 }
0x1167   :  { %1913 = vrot.lane.b32.xlu1 %v4071_v58, %s3623_s21 }
0x116a   :  { %1915 = vrot.lane.b32.xlu0 %v4069_v34, %s3623_s21 }
0x116b   :  { %1911 = vrot.lane.b32.xlu1 %v4069_v34, %s3624_s22 }
0x116e   :  { %1707 = vrot.lane.b32.xlu0 %v4069_v34, %s3619_s14 }
0x1172   :  { %1909 = vrot.lane.b32.xlu0 %v4071_v58, %s3624_s22 }
0x11db   :  { %v1613_v41 = vpop.xlane.xlu1 %1612 }
0x11dc   :  { %3567 = vrcp.f32 %v1613_v41 }
0x11dd   :  { %v1610_v0 = vpop.xlane.xlu0 %1609 }
0x11de   :  { %3569 = vrcp.f32 %v1610_v0 }
0x11df   :  { %v1706_v1 = vpop.permute.xlu1 %1705 }
0x11e1   :  { %v1916_v2 = vpop.permute.xlu0 %1915 }
0x11e2   :  { %3393 = vmatprep.subr.msk.mxu0 %vm179_vm1, %v1916_v2 }
0x11e3   :  { %3394 = vmatpush3.xpose.msk.msra.mxu0 %vm179_vm1, %v1916_v2  ;;  %v1914_v59 = vpop.permute.xlu1 %1913 }
0x11e4   :  { %3395 = vmatprep.subr.msk.mxu0 %vm179_vm1, %v1914_v59 }
0x11e5   :  { %v1708_v17 = vpop.permute.xlu0 %1707 }
0x11e7   :  { %3396 = vmatpush3.xpose.msk.msra.mxu0 %vm179_vm1, %v1914_v59  ;;  %v1912_v8 = vpop.permute.xlu1 %1911 }
0x11e9   :  { %v1910_v3 = vpop.permute.xlu0 %1909  ;;  %v3568_v7 = vpop.eup %3567 }
0x11ea   :  { %3397 = vmatprep.mubr.msk.f32.mxu0 %vm179_vm1, %v1910_v3  ;;  %v1617_v11 = vmul.f32 %v3568_v7, %v3564_v15 }
0x11eb   :  { %v3570_v9 = vpop.eup %3569  ;;  %3398 = vmatmul.mubr.msk.f32.vlgmr.msra.gmra.mxu0 %vm179_vm1, %v1912_v8 }
0x11ec   :  { %v1616_v10 = vmul.f32 %v3570_v9, %v3566_v61 }
0x11ee   :  { %3376 = vmatprep.mubr.msk.f32.mxu1 %vm267_vm2, %v1616_v10 }
0x11ef   :  { %3377 = vmatmul.mubr.msk.f32.vlgmr.msra.gmra.mxu1 %vm267_vm2, %v1617_v11 }
0x11f0   :  { %3380 = vmatpush3.xpose.msk.msra.mxu1 %vm179_vm1, %v1712_v56  ;;  %3383 = vmatprep.mubr.msk.f32.mxu1 %vm179_vm1, %v1706_v1 }
0x11f1   :  { %3381 = vmatprep.subr.msk.mxu1 %vm179_vm1, %v1710_v63 }
0x11f4   :  { %3382 = vmatpush3.xpose.msk.msra.mxu1 %vm179_vm1, %v1710_v63 }
0x11f7   :  { %3384 = vmatmul.mubr.msk.f32.vlgmr.msra.gmra.mxu1 %vm179_vm1, %v1708_v17 }
0x12ab   :  { %v3399_v18 = vpop.f32.mrf.mxu0 }
0x12ac   :  { %v2001_v40 = vmul.f32 0.35355338, %v3399_v18 }
0x12ad   :  { %v1991_v22 = vpop.f32.mrf.mxu0 }
0x12ae   :  { %v2000_v29 = vmul.f32 0.35355338, %v1991_v22  ;;  %v2003_v38 = vadd.f32 %v4132_v32, %v2001_v40 }
0x12af   :  { %v4125_v12 = vpop.f32.mrf.mxu1 }
0x12b0   :  { %v2002_v44 = vadd.f32 %v4139_v37, %v2000_v29  ;;  %v2007_v36 = vsel %vm267_vm2, %v2003_v38, -inf }
0x12b1   :  { %v4127_v19 = vpop.f32.mrf.mxu1 }
0x12b2   :  { %v2004_v45 = vsel %vm267_vm2, %v2002_v44, -inf }
0x12b7   :  { %v3385_v23 = vpop.f32.mrf.mxu1 }
0x12b8   :  { %v1797_v24 = vmul.f32 0.35355338, %v3385_v23 }
0x12b9   :  { %v1787_v27 = vpop.f32.mrf.mxu1 }
0x12ba   :  { %v1796_v57 = vmul.f32 0.35355338, %v1787_v27  ;;  %v1799_v33 = vadd.f32 %v4132_v32, %v1797_v24 }
0x12bc   :  { %v1803_v35 = vsel %vm267_vm2, %v1799_v33, -inf  ;;  %v1798_v39 = vadd.f32 %v4139_v37, %v1796_v57 }
0x12bd   :  { %1804 = vmax.xlane.f32.xlu1 %v1803_v35 }
0x12be   :  { %v1800_v42 = vsel %vm267_vm2, %v1798_v39, -inf }
0x12bf   :  { %1801 = vmax.xlane.f32.xlu0 %v1800_v42 }
0x12c3   :  { %2005 = vmax.xlane.f32.xlu0 %v2004_v45 }
0x12c7   :  { %2008 = vmax.xlane.f32.xlu0 %v2007_v36 }
0x1346   :  { %v1805_v51 = vpop.xlane.xlu1 %1804 }
0x1347   :  { %v1807_v54 = vsub.f32 %v1799_v33, %v1805_v51 }
0x1348   :  { %v1802_v46 = vpop.xlane.xlu0 %1801 }
0x1349   :  { %v1806_v47 = vsub.f32 %v1798_v39, %v1802_v46  ;;  %v1810_v56 = vmul.f32 1.442695, %v1807_v54 }
0x134b   :  { %v1808_v52 = vmul.f32 1.442695, %v1806_v47 }
0x134c   :  { %v2006_v49 = vpop.xlane.xlu0 %2005 }
0x134d   :  { %v2010_v50 = vsub.f32 %v2002_v44, %v2006_v49 }
0x134f   :  { %v2012_v53 = vmul.f32 1.442695, %v2010_v50 }
0x1350   :  { %v2009_v43 = vpop.xlane.xlu0 %2008 }
0x1351   :  { %3571 = vpow2.f32 %v2012_v53  ;;  %v2011_v55 = vsub.f32 %v2003_v38, %v2009_v43 }
0x1352   :  { %3573 = vpow2.f32 %v1808_v52 }
0x1353   :  { %v2014_v15 = vmul.f32 1.442695, %v2011_v55 }
0x1355   :  { %3575 = vpow2.f32 %v2014_v15 }
0x1356   :  { %3577 = vpow2.f32 %v1810_v56 }
0x135e   :  { %v3572_v16 = vpop.eup %3571 }
0x135f   :  { %v2016_v61 = vsel %vm267_vm2, %v3572_v16, 0.0  ;;  %v3574_v62 = vpop.eup %3573 }
0x1360   :  { %2017 = vadd.xlane.f32.xlu0 %v2016_v61  ;;  %v1812_v41 = vsel %vm267_vm2, %v3574_v62, 0.0 }
0x1362   :  { %v3576_v63 = vpop.eup %3575 }
0x1363   :  { %v2019_v0 = vsel %vm267_vm2, %v3576_v63, 0.0  ;;  %v3578_v1 = vpop.eup %3577 }
0x1364   :  { %1813 = vadd.xlane.f32.xlu0 %v1812_v41  ;;  %2020 = vadd.xlane.f32.xlu1 %v2019_v0  ;;  %v1815_v2 = vsel %vm267_vm2, %v3578_v1, 0.0 }
0x1368   :  { %1816 = vadd.xlane.f32.xlu1 %v1815_v2 }
0x1379   :  { %1822 = vrot.lane.b32.xlu1 %v4071_v58, %s3622_s0 }
0x137a   :  { %1824 = vrot.lane.b32.xlu0 %v4069_v34, %s3622_s0  ;;  %s4396_s0 = smov 24  }
0x137d   :  { %2028 = vrot.lane.b32.xlu1 %v4069_v34, %s3625_s23 }
0x137e   :  { %2119 = vrot.lane.b32.xlu0 %v4069_v34, %s3626_s24 }
0x1381   :  { %2026 = vrot.lane.b32.xlu1 %v4071_v58, %s3625_s23 }
0x1382   :  { %2113 = vrot.lane.b32.xlu0 %v4071_v58, %s3627_s25 }
0x1385   :  { %2117 = vrot.lane.b32.xlu1 %v4071_v58, %s3626_s24 }
0x1389   :  { %2115 = vrot.lane.b32.xlu1 %v4069_v34, %s3627_s25 }
0x13e9   :  { %v2018_v59 = vpop.xlane.xlu0 %2017 }
0x13ed   :  { %v1814_v17 = vpop.xlane.xlu0 %1813  ;;  %v2021_v3 = vpop.xlane.xlu1 %2020 }
0x13ee   :  { %3579 = vrcp.f32 %v1814_v17 }
0x13ef   :  { %3581 = vrcp.f32 %v2018_v59 }
0x13f1   :  { %v1825_v7 = vpop.permute.xlu0 %1824  ;;  %v1817_v8 = vpop.xlane.xlu1 %1816 }
0x13f2   :  { %3583 = vrcp.f32 %v1817_v8  ;;  %3386 = vmatprep.subr.mxu1 %v1825_v7 }
0x13f3   :  { %3387 = vmatpush3.msra.mxu1 %v1825_v7  ;;  %3585 = vrcp.f32 %v2021_v3 }
0x13f5   :  { %v1823_v9 = vpop.permute.xlu1 %1822  ;;  %v2120_v24 = vpop.permute.xlu0 %2119 }
0x13f6   :  { %3388 = vmatprep.subr.mxu1 %v1823_v9 }
0x13f7   :  { %3389 = vmatpush3.msra.mxu1 %v1823_v9 }
0x13f9   :  { %v2029_v10 = vpop.permute.xlu1 %2028  ;;  %v2114_v39 = vpop.permute.xlu0 %2113 }
0x13fa   :  { %3400 = vmatprep.subr.mxu1 %v2029_v10 }
0x13fb   :  { %v3580_v11 = vpop.eup %3579 }
0x13fc   :  { %v1820_v18 = vmul.f32 %v3580_v11, %v3574_v62  ;;  %v3582_v22 = vpop.eup %3581 }
0x13fd   :  { %v2027_v57 = vpop.permute.xlu1 %2026  ;;  %v2024_v33 = vmul.f32 %v3582_v22, %v3572_v16 }
0x13fe   :  { %3390 = vmatprep.mubr.msk.f32.mxu1 %vm267_vm2, %v1820_v18 }
0x13ff   :  { %v3584_v23 = vpop.eup %3583 }
0x1400   :  { %v1821_v27 = vmul.f32 %v3584_v23, %v3578_v1  ;;  %v3586_v29 = vpop.eup %3585 }
0x1401   :  { %v2025_v35 = vmul.f32 %v3586_v29, %v3576_v63  ;;  %v2118_v40 = vpop.permute.xlu1 %2117 }
0x1402   :  { %3391 = vmatmul.mubr.msk.f32.vlgmr.msra.gmra.mxu1 %vm267_vm2, %v1821_v27 }
0x1403   :  { %3401 = vmatpush3.msra.mxu1 %v2029_v10  ;;  %3404 = vmatprep.mubr.msk.f32.mxu1 %vm267_vm2, %v2024_v33 }
0x1404   :  { %3402 = vmatprep.subr.mxu1 %v2027_v57 }
0x1405   :  { %3403 = vmatpush3.msra.mxu1 %v2027_v57  ;;  %v2116_v42 = vpop.permute.xlu1 %2115 }
0x1406   :  { %3407 = vmatprep.subr.msk.mxu1 %vm179_vm1, %v2120_v24  ;;  %3405 = vmatmul.mubr.msk.f32.vlgmr.msra.gmra.mxu1 %vm267_vm2, %v2025_v35 }
0x1407   :  { %3408 = vmatpush3.xpose.msk.msra.mxu1 %vm179_vm1, %v2120_v24  ;;  %3411 = vmatprep.mubr.msk.f32.mxu1 %vm179_vm1, %v2114_v39 }
0x1408   :  { %3409 = vmatprep.subr.msk.mxu1 %vm179_vm1, %v2118_v40 }
0x140b   :  { %3410 = vmatpush3.xpose.msk.msra.mxu1 %vm179_vm1, %v2118_v40 }
0x140e   :  { %3412 = vmatmul.mubr.msk.f32.vlgmr.msra.gmra.mxu1 %vm179_vm1, %v2116_v42 }
0x14c2   :  { %v3392_v44 = vpop.f32.mrf.mxu1 }
0x14c4   :  { %v1900_v45 = vpop.f32.mrf.mxu1 }
0x14c6   :  { %v3406_v38 = vpop.f32.mrf.mxu1 }
0x14c8   :  { %v2104_v36 = vpop.f32.mrf.mxu1 }
0x14ce   :  { %v3413_v46 = vpop.f32.mrf.mxu1 }
0x14cf   :  { %v2205_v47 = vmul.f32 0.35355338, %v3413_v46 }
0x14d0   :  { %v2195_v51 = vpop.f32.mrf.mxu1 }
0x14d1   :  { %v2204_v49 = vmul.f32 0.35355338, %v2195_v51  ;;  %v2207_v50 = vadd.f32 %v4132_v32, %v2205_v47 }
0x14d3   :  { %v2211_v54 = vsel %vm267_vm2, %v2207_v50, -inf  ;;  %v2206_v52 = vadd.f32 %v4139_v37, %v2204_v49 }
0x14d4   :  { %2212 = vmax.xlane.f32.xlu1 %v2211_v54 }
0x14d5   :  { %v2208_v53 = vsel %vm267_vm2, %v2206_v52, -inf }
0x14d6   :  { %2209 = vmax.xlane.f32.xlu0 %v2208_v53 }
0x14e5   :  { %2230 = vrot.lane.b32.xlu1 %v4071_v58, %s3628_s26 }
0x14e9   :  { %2361 = vrot.lane.b32.xlu1 %v4024_v60, %s3629_s27 }
0x14ed   :  { %2359 = vrot.lane.b32.xlu1 %v4029_v4, %s3629_s27 }
0x14f1   :  { %2357 = vrot.lane.b32.xlu1 %v4036_v5, %s3629_s27 }
0x14f5   :  { %2327 = vrot.lane.b32.xlu1 %v2104_v36, %s4394_s1 }
0x155d   :  { %v2213_v32 = vpop.xlane.xlu1 %2212 }
0x155e   :  { %v2215_v37 = vsub.f32 %v2207_v50, %v2213_v32  ;;  %v3054_v32 = vld [vmem:[%s4382_s4 + $0x30] sm:$0xff] }
0x155f   :  { %v2210_v43 = vpop.xlane.xlu0 %2209 }
0x1560   :  { %v2218_v55 = vmul.f32 1.442695, %v2215_v37  ;;  %v2214_v56 = vsub.f32 %v2206_v52, %v2210_v43  ;;  %v3053_v37 = vld [vmem:[%s4382_s4 + $0x28] sm:$0xff]  ;;  %v3052_v43 = vld [vmem:[%s4382_s4 + $0x20] sm:$0xff] }
0x1561   :  { %v2231_v62 = vpop.permute.xlu1 %2230 }
0x1562   :  { %3587 = vpow2.f32 %v2218_v55  ;;  %v2216_v15 = vmul.f32 1.442695, %v2214_v56 }
0x1564   :  { %3589 = vpow2.f32 %v2216_v15 }
0x1565   :  { %v2362_v41 = vpop.permute.xlu1 %2361 }
0x1569   :  { %v2360_v1 = vpop.permute.xlu1 %2359 }
0x156f   :  { %v3588_v58 = vpop.eup %3587 }
0x1570   :  { %v2223_v16 = vsel %vm267_vm2, %v3588_v58, 0.0 }
0x1571   :  { %v3590_v60 = vpop.eup %3589  ;;  %2224 = vadd.xlane.f32.xlu0 %v2223_v16 }
0x1572   :  { %v2220_v4 = vsel %vm267_vm2, %v3590_v60, 0.0 }
0x1575   :  { %2221 = vadd.xlane.f32.xlu0 %v2220_v4 }
0x158b   :  { %2232 = vrot.lane.b32.xlu0 %v4069_v34, %s3628_s26 }
0x158f   :  { %2319 = vrot.lane.b32.xlu0 %v1900_v45, %s4395_s20 }
0x1593   :  { %2321 = vrot.lane.b32.xlu0 %v3392_v44, %s4395_s20 }
0x1597   :  { %2329 = vrot.lane.b32.xlu0 %v3406_v38, %s4394_s1 }
0x159b   :  { %2355 = vrot.lane.b32.xlu0 %v4043_v6, %s3629_s27  ;;  %v2358_v6 = vpop.permute.xlu1 %2357 }
0x159f   :  { %v2328_v11 = vpop.permute.xlu1 %2327 }
0x15fa   :  { %v2225_v5 = vpop.xlane.xlu0 %2224 }
0x15fb   :  { %3591 = vrcp.f32 %v2225_v5 }
0x15fe   :  { %v2222_v61 = vpop.xlane.xlu0 %2221 }
0x15ff   :  { %3593 = vrcp.f32 %v2222_v61 }
0x1602   :  { %v2233_v63 = vpop.permute.xlu0 %2232 }
0x1603   :  { %3414 = vmatprep.subr.mxu0 %v2233_v63 }
0x1604   :  { %3415 = vmatpush3.msra.mxu0 %v2233_v63 }
0x1605   :  { %3416 = vmatprep.subr.mxu0 %v2231_v62 }
0x1606   :  { %3417 = vmatpush3.msra.mxu0 %v2231_v62  ;;  %v2320_v17 = vpop.permute.xlu0 %2319 }
0x1607   :  { %3421 = vmatprep.subr.mxu0 %v2362_v41  ;;  %v2341_v18 = vsel %vm179_vm1, %v4127_v19, %v2320_v17  ;;  %v4216_v19 = vld [vmem:[%s4381_s6 + $0x8] sm:$0xff]  ;;  %v3070_v17 = vld [vmem:[%s4383_s5 + $0xe0] sm:$0xff] }
0x1608   :  { %v3592_v34 = vpop.eup %3591  ;;  %v2343_v23 = vsel %vm267_vm2, %v2341_v18, %v2328_v11  ;;  %v2350_v35 = vrot.slane %v4216_v19, %v3734_v26  ;;  %v2479_v4 = vrot.slane %v4216_v19, %v3740_v28  ;;  %v2485_v62 = vrot.slane %v4216_v19, %v3931_v14  ;;  %v3073_v28 = vld [vmem:[%s4383_s5 + $0xf8] sm:$0xff]  ;;  %v3064_v11 = vld [vmem:[%s4383_s5 + $0xb0] sm:$0xff]  ;;  %v3063_v18 = vld [vmem:[%s4383_s5 + $0xa8] sm:$0xff] }
0x1609   :  { %v2229_v59 = vmul.f32 %v3592_v34, %v3588_v58 }
0x160a   :  { %v2322_v3 = vpop.permute.xlu0 %2321 }
0x160b   :  { %v2342_v27 = vsel %vm179_vm1, %v4125_v12, %v2322_v3  ;;  %v3069_v3 = vld [vmem:[%s4383_s5 + $0xd8] sm:$0xff] }
0x160c   :  { %v3594_v0 = vpop.eup %3593 }
0x160d   :  { %v2228_v2 = vmul.f32 %v3594_v0, %v3590_v60 }
0x160e   :  { %v2330_v7 = vpop.permute.xlu0 %2329 }
0x160f   :  { %3418 = vmatprep.mubr.msk.f32.mxu0 %vm267_vm2, %v2228_v2  ;;  %v2344_v29 = vsel %vm267_vm2, %v2342_v27, %v2330_v7  ;;  %v3068_v7 = vld [vmem:[%s4383_s5 + $0xd0] sm:$0xff]  ;;  %v3059_v27 = vld [vmem:[%s4383_s5 + $0x88] sm:$0xff] }
0x1610   :  { %3419 = vmatmul.mubr.msk.f32.vlgmr.msra.gmra.mxu0 %vm267_vm2, %v2229_v59  ;;  %v3072_v59 = vld [vmem:[%s4383_s5 + $0xf0] sm:$0xff] }
0x1611   :  { %3422 = vmatpush3.msra.mxu0 %v2362_v41 }
0x1612   :  { %3423 = vmatprep.subr.mxu0 %v2360_v1  ;;  %v2356_v8 = vpop.permute.xlu0 %2355 }
0x1613   :  { %3424 = vmatpush3.msra.mxu0 %v2360_v1 }
0x1614   :  { %3425 = vmatprep.subr.mxu0 %v2358_v6 }
0x1615   :  { %3426 = vmatpush3.msra.mxu0 %v2358_v6  ;;  %v3071_v6 = vld [vmem:[%s4383_s5 + $0xe8] sm:$0xff] }
0x1616   :  { %3427 = vmatprep.subr.mxu0 %v2356_v8 }
0x1617   :  { %3428 = vmatpush3.msra.mxu0 %v2356_v8  ;;  %v3067_v8 = vld [vmem:[%s4383_s5 + $0xc8] sm:$0xff] }
0x1618   :  { %3443 = vmatprep.subr.mxu0 %v3073_v28 }
0x16d0   :  { %v3420_v9 = vpop.f32.mrf.mxu0 }
0x16d2   :  { %v2308_v10 = vpop.f32.mrf.mxu0 }
0x16d3   :  { %2335 = vrot.lane.b32.xlu1 %v2308_v10, %s4396_s0  ;;  %v3065_v10 = vld [vmem:[%s4383_s5 + $0xb8] sm:$0xff] }
0x16d7   :  { %2337 = vrot.lane.b32.xlu1 %v3420_v9, %s4396_s0  ;;  %v3066_v9 = vld [vmem:[%s4383_s5 + $0xc0] sm:$0xff] }
0x1745   :  { %v2336_v22 = vpop.permute.xlu1 %2335 }
0x1746   :  { %v2345_v24 = vsel %vm1017_vm3, %v2343_v23, %v2336_v22  ;;  %v3062_v22 = vld [vmem:[%s4383_s5 + $0xa0] sm:$0xff]  ;;  %v3061_v23 = vld [vmem:[%s4383_s5 + $0x98] sm:$0xff] }
0x1747   :  { %3429 = vmatprep.mubr.msk.f32.mxu0 %vm40_vm0, %v2345_v24  ;;  %v3060_v24 = vld [vmem:[%s4383_s5 + $0x90] sm:$0xff] }
0x1749   :  { %v2338_v57 = vpop.permute.xlu1 %2337 }
0x174a   :  { %v2346_v33 = vsel %vm1017_vm3, %v2344_v29, %v2338_v57  ;;  %v3058_v29 = vld [vmem:[%s4383_s5 + $0x80] sm:$0xff]  ;;  %v2496_v57 = vrot.slane %v4216_v19, %v3994_v20 }
0x174b   :  { %3430 = vmatmul.mubr.msk.f32.vlgmr.msra.gmra.mxu0 %vm40_vm0, %v2346_v33 }
0x174c   :  { %3444 = vmatpush3.msra.mxu0 %v3073_v28 }
0x174d   :  { %3445 = vmatprep.subr.mxu0 %v3072_v59 }
0x174e   :  { %3446 = vmatpush3.msra.mxu0 %v3072_v59 }
0x174f   :  { %3447 = vmatprep.subr.mxu0 %v3071_v6 }
0x1750   :  { %3448 = vmatpush3.msra.mxu0 %v3071_v6  ;;  %v2740_v6 = vld [vmem:[%s4386_s7 + $0x10] sm:$0xff] }
0x1751   :  { %3449 = vmatprep.subr.mxu0 %v3070_v17 }
0x1752   :  { %3450 = vmatpush3.msra.mxu0 %v3070_v17  ;;  %v2739_v17 = vld [vmem:[%s4386_s7 + $0x8] sm:$0xff] }
0x1753   :  { %3451 = vmatprep.subr.mxu0 %v3069_v3 }
0x1754   :  { %3452 = vmatpush3.msra.mxu0 %v3069_v3  ;;  %v2738_v3 = vld [vmem:[%s4386_s7] sm:$0xff] }
0x1755   :  { %3453 = vmatprep.subr.mxu0 %v3068_v7 }
0x1756   :  { %3454 = vmatpush3.msra.mxu0 %v3068_v7 }
0x1757   :  { %3455 = vmatprep.subr.mxu0 %v3067_v8 }
0x1758   :  { %3456 = vmatpush3.msra.mxu0 %v3067_v8 }
0x1759   :  { %3457 = vmatprep.subr.mxu0 %v3066_v9 }
0x175a   :  { %3458 = vmatpush3.msra.mxu0 %v3066_v9 }
0x175b   :  { %3459 = vmatprep.subr.mxu0 %v3065_v10 }
0x175c   :  { %3460 = vmatpush3.msra.mxu0 %v3065_v10 }
0x175d   :  { %3461 = vmatprep.subr.mxu0 %v3064_v11 }
0x175e   :  { %3462 = vmatpush3.msra.mxu0 %v3064_v11 }
0x175f   :  { %3463 = vmatprep.subr.mxu0 %v3063_v18 }
0x1760   :  { %3464 = vmatpush3.msra.mxu0 %v3063_v18 }
0x1761   :  { %3465 = vmatprep.subr.mxu0 %v3062_v22 }
0x1762   :  { %3466 = vmatpush3.msra.mxu0 %v3062_v22 }
0x1763   :  { %3467 = vmatprep.subr.mxu0 %v3061_v23 }
0x1764   :  { %3468 = vmatpush3.msra.mxu0 %v3061_v23  ;;  %v2729_v23 = vrot.slane %v4216_v19, %v4050_v13 }
0x1765   :  { %3469 = vmatprep.subr.mxu0 %v3060_v24 }
0x1766   :  { %3470 = vmatpush3.msra.mxu0 %v3060_v24 }
0x1767   :  { %3471 = vmatprep.subr.mxu0 %v3059_v27 }
0x1768   :  { %3472 = vmatpush3.msra.mxu0 %v3059_v27 }
0x1769   :  { %3473 = vmatprep.subr.mxu0 %v3058_v29 }
0x176a   :  { %3474 = vmatpush3.msra.mxu0 %v3058_v29 }
0x180b   :  { %v3431_v39 = vpop.f32.mrf.mxu0 }
0x180c   :  { %v2445_v40 = vadd.f32 %v3431_v39, %v2350_v35 }
0x180d   :  { %v2439_v42 = vpop.f32.mrf.mxu0 }
0x180e   :  { %v2449_v12 = vadd.f32 %v2445_v40, %v4060_v31  ;;  %v2440_v44 = vadd.f32 %v2439_v42, %v2350_v35 }
0x1810   :  { %v2448_v45 = vadd.f32 %v2440_v44, %v4058_v30  ;;  %v2453_v38 = vsel %vm40_vm0, %v2449_v12, 0.0  ;;  %v3055_v30 = vld [vmem:[%s4382_s4 + $0x38] sm:$0xff] }
0x1811   :  { %2454 = vadd.xlane.f32.xlu1 %v2453_v38  ;;  %3432 = vmatprep.subr.mxu1 %v3055_v30 }
0x1812   :  { %v2450_v36 = vsel %vm40_vm0, %v2448_v45, 0.0  ;;  %3433 = vmatpush3.msra.mxu1 %v3055_v30 }
0x1813   :  { %2451 = vadd.xlane.f32.xlu0 %v2450_v36  ;;  %3434 = vmatprep.subr.mxu1 %v3054_v32 }
0x1814   :  { %3435 = vmatpush3.msra.mxu1 %v3054_v32 }
0x1815   :  { %3436 = vmatprep.subr.mxu1 %v3053_v37 }
0x1816   :  { %3437 = vmatpush3.msra.mxu1 %v3053_v37  ;;  %v2616_v37 = vrot.slane %v4216_v19, %v4005_v48 }
0x1817   :  { %3438 = vmatprep.subr.mxu1 %v3052_v43 }
0x1818   :  { %3439 = vmatpush3.msra.mxu1 %v3052_v43 }
0x189a   :  { %v2455_v46 = vpop.xlane.xlu1 %2454 }
0x189b   :  { %v2457_v47 = vmul.f32 0.03125, %v2455_v46 }
0x189c   :  { %v2452_v51 = vpop.xlane.xlu0 %2451 }
0x189d   :  { %v2456_v49 = vmul.f32 0.03125, %v2452_v51  ;;  %v2459_v50 = vsub.f32 %v2449_v12, %v2457_v47 }
0x189f   :  { %v2458_v26 = vsub.f32 %v2448_v45, %v2456_v49  ;;  %v2461_v53 = vmul.f32 %v2459_v50, %v2459_v50 }
0x18a1   :  { %v2460_v54 = vmul.f32 %v2458_v26, %v2458_v26  ;;  %v2465_v31 = vsel %vm40_vm0, %v2461_v53, 0.0 }
0x18a3   :  { %v2462_v52 = vsel %vm40_vm0, %v2460_v54, 0.0 }
0x18a4   :  { %2463 = vadd.xlane.f32.xlu0 %v2462_v52 }
0x18a8   :  { %2466 = vadd.xlane.f32.xlu0 %v2465_v31 }
0x192d   :  { %v2464_v55 = vpop.xlane.xlu0 %2463 }
0x192e   :  { %v2468_v56 = vmul.f32 0.03125, %v2464_v55 }
0x1930   :  { %v2470_v15 = vadd.f32 1e-12, %v2468_v56 }
0x1931   :  { %v2467_v58 = vpop.xlane.xlu0 %2466 }
0x1932   :  { %3595 = vrsqrt.f32 %v2470_v15  ;;  %v2469_v16 = vmul.f32 0.03125, %v2467_v58 }
0x1934   :  { %v2471_v60 = vadd.f32 1e-12, %v2469_v16 }
0x1936   :  { %3597 = vrsqrt.f32 %v2471_v60 }
0x193f   :  { %v3596_v5 = vpop.eup %3595 }
0x1940   :  { %v2474_v61 = vmul.f32 %v3596_v5, %v2458_v26 }
0x1942   :  { %v2480_v63 = vmul.f32 %v2479_v4, %v2474_v61 }
0x1943   :  { %v3598_v41 = vpop.eup %3597 }
0x1944   :  { %v2475_v34 = vmul.f32 %v3598_v41, %v2459_v50  ;;  %v4242_v0 = vadd.f32 %v2485_v62, %v2480_v63 }
0x1946   :  { %v2481_v1 = vmul.f32 %v2479_v4, %v2475_v34  ;;  %3440 = vmatprep.mubr.msk.f32.mxu1 %vm40_vm0, %v4242_v0 }
0x1948   :  { %v4246_v2 = vadd.f32 %v2485_v62, %v2481_v1 }
0x194a   :  { %3441 = vmatmul.mubr.msk.f32.vlgmr.msra.gmra.mxu1 %vm40_vm0, %v4246_v2 }
0x1a0a   :  { %v3442_v33 = vpop.f32.mrf.mxu1 }
0x1a0b   :  { %v2575_v35 = vadd.f32 %v3442_v33, %v2496_v57  ;;  %v2735_v33 = vrot.slane %v4216_v19, %v1403_v21 }
0x1a0c   :  { %v2569_v39 = vpop.f32.mrf.mxu1 }
0x1a0d   :  { %v2579_v40 = vmul.f32 %v2575_v35, %v2575_v35  ;;  %v2570_v42 = vadd.f32 %v2569_v39, %v2496_v57 }
0x1a0f   :  { %v2581_v12 = vmul.f32 %v2579_v40, %v2575_v35  ;;  %v2578_v44 = vmul.f32 %v2570_v42, %v2570_v42 }
0x1a11   :  { %v2583_v45 = vmul.f32 0.044715, %v2581_v12  ;;  %v2580_v38 = vmul.f32 %v2578_v44, %v2570_v42 }
0x1a13   :  { %v2585_v36 = vadd.f32 %v2583_v45, %v2575_v35  ;;  %v2582_v46 = vmul.f32 0.044715, %v2580_v38 }
0x1a15   :  { %v2587_v47 = vmul.f32 0.7978846, %v2585_v36  ;;  %v2584_v51 = vadd.f32 %v2582_v46, %v2570_v42 }
0x1a17   :  { %3599 = vtanh.f32 %v2587_v47  ;;  %v2586_v49 = vmul.f32 0.7978846, %v2584_v51 }
0x1a19   :  { %3601 = vtanh.f32 %v2586_v49 }
0x1a24   :  { %v3600_v50 = vpop.eup %3599 }
0x1a25   :  { %v2591_v26 = vadd.f32 1.0, %v3600_v50 }
0x1a26   :  { %v3602_v54 = vpop.eup %3601 }
0x1a27   :  { %v2590_v52 = vadd.f32 1.0, %v3602_v54  ;;  %v2593_v53 = vmul.f32 0.5, %v2591_v26 }
0x1a29   :  { %v2592_v31 = vmul.f32 0.5, %v2590_v52  ;;  %v2595_v30 = vmul.f32 %v2593_v53, %v2575_v35 }
0x1a2b   :  { %v2594_v32 = vmul.f32 %v2592_v31, %v2570_v42  ;;  %3075 = vst [vmem:[%s4384_s10 + $0x18] sm:$0xff] %v2595_v30  ;;  %v4342_v42 = vld [vmem:[%s4378_s8] sm:$0xff] }
0x1a2c   :  { %v2749_v12 = vrot.slane %v4342_v42, %v3931_v14 }
0x1a2d   :  { %3475 = vmatprep.mubr.f32.mxu0 %v2594_v32  ;;  %3074 = vst [vmem:[%s4384_s10 + $0x10] sm:$0xff] %v2594_v32 }
0x1a2e   :  { %3476 = vmatmul.mubr.f32.vlgmr.msra.gmra.mxu0 %v2595_v30 }
0x1aee   :  { %v3477_v43 = vpop.f32.mrf.mxu0 }
0x1aef   :  { %v2689_v55 = vadd.f32 %v3477_v43, %v2616_v37 }
0x1af0   :  { %v2683_v56 = vpop.f32.mrf.mxu0 }
0x1af1   :  { %3077 = vst [vmem:[%s4385_s11 + $0x18] sm:$0xff] %v2689_v55  ;;  %v2699_v15 = vadd.f32 %v2689_v55, %v4246_v2  ;;  %v2684_v58 = vadd.f32 %v2683_v56, %v2616_v37 }
0x1af3   :  { %3076 = vst [vmem:[%s4385_s11 + $0x10] sm:$0xff] %v2684_v58  ;;  %v2698_v16 = vadd.f32 %v2684_v58, %v4242_v0  ;;  %v2703_v60 = vsel %vm40_vm0, %v2699_v15, 0.0  ;;  %v2741_v0 = vld [vmem:[%s4386_s7 + $0x18] sm:$0xff] }
0x1af4   :  { %2704 = vadd.xlane.f32.xlu1 %v2703_v60  ;;  %3478 = vmatprep.subr.mxu1 %v2741_v0 }
0x1af5   :  { %v2700_v4 = vsel %vm40_vm0, %v2698_v16, 0.0  ;;  %3479 = vmatpush3.msra.mxu1 %v2741_v0 }
0x1af6   :  { %2701 = vadd.xlane.f32.xlu0 %v2700_v4  ;;  %3480 = vmatprep.subr.mxu1 %v2740_v6 }
0x1af7   :  { %3481 = vmatpush3.msra.mxu1 %v2740_v6 }
0x1af8   :  { %3482 = vmatprep.subr.mxu1 %v2739_v17 }
0x1af9   :  { %3483 = vmatpush3.msra.mxu1 %v2739_v17 }
0x1afa   :  { %3484 = vmatprep.subr.mxu1 %v2738_v3 }
0x1afb   :  { %3485 = vmatpush3.msra.mxu1 %v2738_v3 }
0x1b7d   :  { %v2705_v5 = vpop.xlane.xlu1 %2704 }
0x1b7e   :  { %v2707_v61 = vmul.f32 0.03125, %v2705_v5 }
0x1b7f   :  { %v2702_v62 = vpop.xlane.xlu0 %2701 }
0x1b80   :  { %v2709_v63 = vsub.f32 %v2699_v15, %v2707_v61  ;;  %v2706_v41 = vmul.f32 0.03125, %v2702_v62 }
0x1b82   :  { %v2708_v34 = vsub.f32 %v2698_v16, %v2706_v41  ;;  %v2711_v1 = vmul.f32 %v2709_v63, %v2709_v63 }
0x1b84   :  { %v2715_v2 = vsel %vm40_vm0, %v2711_v1, 0.0  ;;  %v2710_v28 = vmul.f32 %v2708_v34, %v2708_v34  ;;  %v2744_v1 = vld [vmem:[%s4386_s7 + $0x30] sm:$0xff] }
0x1b85   :  { %2716 = vadd.xlane.f32.xlu1 %v2715_v2  ;;  %v2743_v2 = vld [vmem:[%s4386_s7 + $0x28] sm:$0xff] }
0x1b86   :  { %v2712_v59 = vsel %vm40_vm0, %v2710_v28, 0.0  ;;  %v2742_v28 = vld [vmem:[%s4386_s7 + $0x20] sm:$0xff] }
0x1b87   :  { %2713 = vadd.xlane.f32.xlu0 %v2712_v59 }
0x1c0e   :  { %v2717_v7 = vpop.xlane.xlu1 %2716 }
0x1c0f   :  { %v2719_v8 = vmul.f32 0.03125, %v2717_v7 }
0x1c10   :  { %v2714_v9 = vpop.xlane.xlu0 %2713 }
0x1c11   :  { %v2721_v10 = vadd.f32 1e-12, %v2719_v8  ;;  %v2718_v11 = vmul.f32 0.03125, %v2714_v9  ;;  %v2878_v9 = vrot.slane %v4342_v42, %v3994_v20 }
0x1c13   :  { %3603 = vrsqrt.f32 %v2721_v10  ;;  %v2720_v18 = vadd.f32 1e-12, %v2718_v11 }
0x1c15   :  { %3605 = vrsqrt.f32 %v2720_v18 }
0x1c20   :  { %v3604_v22 = vpop.eup %3603 }
0x1c21   :  { %v2725_v24 = vmul.f32 %v3604_v22, %v2709_v63 }
0x1c22   :  { %v3606_v27 = vpop.eup %3605 }
0x1c23   :  { %v2724_v29 = vmul.f32 %v3606_v27, %v2708_v34  ;;  %v2731_v57 = vmul.f32 %v2729_v23, %v2725_v24  ;;  %v2745_v34 = vld [vmem:[%s4386_s7 + $0x38] sm:$0xff] }
0x1c24   :  { %3489 = vmatprep.subr.mxu1 %v2745_v34 }
0x1c25   :  { %v2730_v35 = vmul.f32 %v2729_v23, %v2724_v29  ;;  %v2737_v40 = vadd.f32 %v2735_v33, %v2731_v57  ;;  %v2884_v23 = vrot.slane %v4342_v42, %v4005_v48  ;;  %v2890_v57 = vrot.slane %v4342_v42, %v4050_v13 }
0x1c27   :  { %v2736_v39 = vadd.f32 %v2735_v33, %v2730_v35 }
0x1c29   :  { %3486 = vmatprep.mubr.msk.f32.mxu1 %vm40_vm0, %v2736_v39 }
0x1c2a   :  { %3487 = vmatmul.mubr.msk.f32.vlgmr.msra.gmra.mxu1 %vm40_vm0, %v2737_v40 }
0x1c2b   :  { %3490 = vmatpush3.msra.mxu1 %v2745_v34 }
0x1c2c   :  { %3491 = vmatprep.subr.mxu1 %v2744_v1 }
0x1c2d   :  { %3492 = vmatpush3.msra.mxu1 %v2744_v1 }
0x1c2e   :  { %3493 = vmatprep.subr.mxu1 %v2743_v2 }
0x1c2f   :  { %3494 = vmatpush3.msra.mxu1 %v2743_v2 }
0x1c30   :  { %3495 = vmatprep.subr.mxu1 %v2742_v28 }
0x1c31   :  { %3496 = vmatpush3.msra.mxu1 %v2742_v28 }
0x1cea   :  { %v3488_v44 = vpop.f32.mrf.mxu1 }
0x1ceb   :  { %v2828_v45 = vadd.f32 %v3488_v44, %v2749_v12 }
0x1cec   :  { %v2822_v25 = vpop.f32.mrf.mxu1 }
0x1ced   :  { %v2832_v38 = vmul.f32 %v2828_v45, %v2828_v45  ;;  %v2823_v21 = vadd.f32 %v2822_v25, %v2749_v12 }
0x1cef   :  { %v2834_v19 = vmul.f32 %v2832_v38, %v2828_v45  ;;  %v2831_v36 = vmul.f32 %v2823_v21, %v2823_v21 }
0x1cf1   :  { %v2836_v46 = vmul.f32 0.044715, %v2834_v19  ;;  %v2833_v47 = vmul.f32 %v2831_v36, %v2823_v21 }
0x1cf3   :  { %v2838_v51 = vadd.f32 %v2836_v46, %v2828_v45  ;;  %v2835_v49 = vmul.f32 0.044715, %v2833_v47 }
0x1cf5   :  { %v2840_v50 = vmul.f32 0.7978846, %v2838_v51  ;;  %v2837_v26 = vadd.f32 %v2835_v49, %v2823_v21 }
0x1cf7   :  { %3607 = vtanh.f32 %v2840_v50  ;;  %v2839_v54 = vmul.f32 0.7978846, %v2837_v26 }
0x1cf9   :  { %3609 = vtanh.f32 %v2839_v54 }
0x1d04   :  { %v3608_v52 = vpop.eup %3607 }
0x1d05   :  { %v2844_v53 = vadd.f32 1.0, %v3608_v52 }
0x1d06   :  { %v3610_v31 = vpop.eup %3609 }
0x1d07   :  { %v2846_v14 = vmul.f32 0.5, %v2844_v53  ;;  %v2843_v30 = vadd.f32 1.0, %v3610_v31 }
0x1d09   :  { %v2848_v32 = vmul.f32 %v2846_v14, %v2828_v45  ;;  %v2845_v37 = vmul.f32 0.5, %v2843_v30 }
0x1d0b   :  { %v2852_v43 = vsel %vm40_vm0, %v2848_v32, 0.0  ;;  %v2847_v55 = vmul.f32 %v2845_v37, %v2823_v21 }
0x1d0c   :  { %2853 = vadd.xlane.f32.xlu1 %v2852_v43 }
0x1d0d   :  { %v2849_v56 = vsel %vm40_vm0, %v2847_v55, 0.0 }
0x1d0e   :  { %2850 = vadd.xlane.f32.xlu0 %v2849_v56 }
0x1d95   :  { %v2854_v15 = vpop.xlane.xlu1 %2853 }
0x1d96   :  { %v2856_v58 = vmul.f32 0.03125, %v2854_v15 }
0x1d97   :  { %v2851_v16 = vpop.xlane.xlu0 %2850 }
0x1d98   :  { %v2858_v60 = vsub.f32 %v2848_v32, %v2856_v58  ;;  %v2855_v4 = vmul.f32 0.03125, %v2851_v16 }
0x1d9a   :  { %v2857_v5 = vsub.f32 %v2847_v55, %v2855_v4  ;;  %v2860_v61 = vmul.f32 %v2858_v60, %v2858_v60 }
0x1d9c   :  { %v2864_v62 = vsel %vm40_vm0, %v2860_v61, 0.0  ;;  %v2859_v63 = vmul.f32 %v2857_v5, %v2857_v5 }
0x1d9d   :  { %2865 = vadd.xlane.f32.xlu1 %v2864_v62 }
0x1d9e   :  { %v2861_v41 = vsel %vm40_vm0, %v2859_v63, 0.0 }
0x1d9f   :  { %2862 = vadd.xlane.f32.xlu0 %v2861_v41 }
0x1e26   :  { %v2866_v59 = vpop.xlane.xlu1 %2865 }
0x1e27   :  { %v2868_v0 = vmul.f32 0.03125, %v2866_v59 }
0x1e28   :  { %v2863_v6 = vpop.xlane.xlu0 %2862 }
0x1e29   :  { %v2870_v17 = vadd.f32 1e-12, %v2868_v0  ;;  %v2867_v3 = vmul.f32 0.03125, %v2863_v6 }
0x1e2b   :  { %3611 = vrsqrt.f32 %v2870_v17  ;;  %v2869_v7 = vadd.f32 1e-12, %v2867_v3 }
0x1e2d   :  { %3613 = vrsqrt.f32 %v2869_v7 }
0x1e38   :  { %v3612_v8 = vpop.eup %3611 }
0x1e39   :  { %v2874_v10 = vmul.f32 %v3612_v8, %v2858_v60 }
0x1e3a   :  { %v3614_v11 = vpop.eup %3613 }
0x1e3b   :  { %v2873_v18 = vmul.f32 %v3614_v11, %v2857_v5  ;;  %v2880_v22 = vmul.f32 %v2878_v9, %v2874_v10 }
0x1e3d   :  { %v2879_v24 = vmul.f32 %v2878_v9, %v2873_v18  ;;  %v2886_v29 = vadd.f32 %v2884_v23, %v2880_v22 }
0x1e3f   :  { %v2885_v27 = vadd.f32 %v2884_v23, %v2879_v24 }
0x1e41   :  { %3497 = vmatprep.mubr.msk.f32.mxu1 %vm40_vm0, %v2885_v27 }
0x1e42   :  { %3498 = vmatmul.mubr.msk.f32.vlgmr.msra.gmra.mxu1 %vm40_vm0, %v2886_v29 }
0x1f02   :  { %v3499_v33 = vpop.f32.mrf.mxu1 }
0x1f03   :  { %v2969_v35 = vadd.f32 %v3499_v33, %v2890_v57 }
0x1f04   :  { %v2963_v20 = vpop.f32.mrf.mxu1 }
0x1f05   :  { %2973 = vst [vmem:[%s4387_s9 + $0x8] sm:$0xff] %v2969_v35  ;;  %v2964_v39 = vadd.f32 %v2963_v20, %v2890_v57 }
0x1f07   :  { %2972 = vst [vmem:[%s4387_s9] sm:$0xff] %v2964_v39 }

</bundles_post_ra>
